<compile_context>
chip_gen: v6e
topology: v6e:2x2x1
jax: 0.10.0
libtpu: 0.0.40
codegen_flags: <defaults>
</compile_context>

<pallas_src>
import jax
import jax.numpy as jnp
from jax.experimental import pallas as pl
from jax.experimental.pallas import tpu as pltpu

C_CONST = 0.85
EPS = 1e-6
LANE = 128


def _round_up(v, m):
    return (v + m - 1) // m * m


def _vmem_limit_bytes():
    # Budget against the chip's physical VMEM (64 MiB on v7x, 128 MiB on
    # v5e/v6e); also raises the small scoped defaults on v5e/v6e.
    try:
        cap = pltpu.get_tpu_info().vmem_capacity_bytes
    except Exception:
        cap = 64 * 1024 * 1024
    return int(cap * 3 // 4)


def _elementwise_tail(axw_f32, n_actual):
    """Shared f32 tail: fused eye add, relu, column-mean norm, softplus."""
    tb, n_pad, out_pad = axw_f32.shape
    v = jnp.float32(C_CONST) * axw_f32
    # Fused eye(N) add: +1 on the diagonal, no materialized (N, out) identity.
    # Padded diagonal entries (i >= n_actual) only live in padded rows/columns,
    # which are sliced away in the wrapper and contribute 0 to real columns.
    row = jax.lax.broadcasted_iota(jnp.int32, (n_pad, out_pad), 0)
    col = jax.lax.broadcasted_iota(jnp.int32, (n_pad, out_pad), 1)
    y = jnp.where(row == col, v + jnp.float32(1.0), v)
    y_relu = jnp.maximum(y, jnp.float32(0.0))
    # Mean over the node axis uses the *actual* node count (padded rows of
    # y_relu are exactly zero in every real column, so the sum is unchanged).
    col_mean = (jnp.sum(y_relu, axis=1, keepdims=True)
                * jnp.float32(1.0 / n_actual) + jnp.float32(EPS))
    y_norm = y_relu * pl.reciprocal(col_mean, approx=True)
    # softplus(x) = log(1 + exp(x))
    return jnp.logaddexp(y_norm, jnp.float32(0.0))


def _make_gcn_kernel(n_actual):
    def kernel(x_ref, adj_ref, w_ref, o_ref):
        tb, n_pad, in_pad = x_ref.shape
        out_pad = w_ref.shape[-1]
        # XW: fold batch into M -> one tall MXU matmul (bf16 in, f32 acc).
        x2 = x_ref[...].reshape(tb * n_pad, in_pad)
        xw = jnp.dot(x2, w_ref[...], preferred_element_type=jnp.float32)
        xw = xw.reshape(tb, n_pad, out_pad).astype(jnp.bfloat16)
        # AXW: batched MXU matmul (bf16 in, f32 acc).
        axw = jnp.einsum("bij,bjk->bik", adj_ref[...], xw,
                         preferred_element_type=jnp.float32)
        o_ref[...] = _elementwise_tail(axw, n_actual).astype(o_ref.dtype)
    return kernel


def _make_gcn_kernel_no_x(n_actual):
    def kernel(adj_ref, w_ref, o_ref):
        tb, n_pad, _ = adj_ref.shape
        out_pad = w_ref.shape[-1]
        # AXW = adj @ W, W shared across batch: fold batch into M.
        a2 = adj_ref[...].reshape(tb * n_pad, n_pad)
        axw = jnp.dot(a2, w_ref[...], preferred_element_type=jnp.float32)
        axw = axw.reshape(tb, n_pad, out_pad)
        o_ref[...] = _elementwise_tail(axw, n_actual).astype(o_ref.dtype)
    return kernel


def gcn_forward(x, adj, kernel_w, neg_penalty=0.0):
    """Pallas implementation of GCN.forward.

    x: (B, N, in_dim) or None; adj: (B, N, N); kernel_w: (in_dim, out_dim).
    Requires out_dim == N (eye add), and in_dim == N when x is None.
    Returns (output, neg_loss).
    """
    B, N, _ = adj.shape
    in_dim, out_dim = kernel_w.shape
    if out_dim != N:
        raise ValueError(f"eye(N) add requires out_dim == N, got {out_dim} != {N}")
    if x is None:
        if in_dim != N:
            raise ValueError("x=None path requires in_dim == N")
    elif x.shape != (B, N, in_dim):
        raise ValueError(f"bad x shape {x.shape}")

    n_pad = _round_up(N, LANE)
    in_pad = _round_up(in_dim, LANE)
    out_pad = n_pad

    # Pad to lane-dense 128-multiples; cast matmul operands to bf16.
    adj_p = jnp.zeros((B, n_pad, n_pad), jnp.bfloat16)
    adj_p = adj_p.at[:, :N, :N].set(adj.astype(jnp.bfloat16))
    w_p = jnp.zeros((in_pad, out_pad), jnp.bfloat16)
    w_p = w_p.at[:in_dim, :out_dim].set(kernel_w.astype(jnp.bfloat16))
    x_p = None
    if x is not None:
        x_p = jnp.zeros((B, n_pad, in_pad), jnp.bfloat16)
        x_p = x_p.at[:, :N, :in_dim].set(x.astype(jnp.bfloat16))

    vmem_limit = _vmem_limit_bytes()
    # Rough per-batch-element VMEM footprint: double-buffered inputs/output
    # plus f32 temporaries inside the kernel.
    per_b = (2 * n_pad * n_pad * 2          # adj (bf16, 2 buffers)
             + 2 * n_pad * out_pad * 4      # out (f32, 2 buffers)
             + 4 * n_pad * out_pad * 4)     # f32 temporaries
    if x is not None:
        per_b += 2 * n_pad * in_pad * 2
    budget = int(vmem_limit * 0.8) - 2 * in_pad * out_pad * 2  # room for W
    tb = max(1, min(B, budget // max(per_b, 1)))
    while B % tb != 0:   # keep the grid exact
        tb -= 1
    grid = (B // tb,)

    out_shape = jax.ShapeDtypeStruct((B, n_pad, out_pad), jnp.float32)

    # Advisory cost estimate for the XLA scheduler.
    mm_flops = 2 * B * n_pad * n_pad * out_pad
    if x is not None:
        mm_flops += 2 * B * n_pad * in_pad * out_pad
    bytes_accessed = (adj_p.size * 2 + w_p.size * 2 + B * n_pad * out_pad * 4
                      + (x_p.size * 2 if x_p is not None else 0))
    cost = pl.CostEstimate(flops=mm_flops,
                           transcendentals=3 * B * n_pad * out_pad,
                           bytes_accessed=bytes_accessed)

    compiler_params = pltpu.CompilerParams(
        dimension_semantics=("parallel",),
        vmem_limit_bytes=vmem_limit)

    if x is None:
        out_p = pl.pallas_call(
            _make_gcn_kernel_no_x(N),
            out_shape=out_shape,
            grid_spec=pltpu.PrefetchScalarGridSpec(
                num_scalar_prefetch=0,
                grid=grid,
                in_specs=[
                    pl.BlockSpec((tb, n_pad, n_pad), lambda b: (b, 0, 0)),
                    pl.BlockSpec((in_pad, out_pad), lambda b: (0, 0)),
                ],
                out_specs=pl.BlockSpec((tb, n_pad, out_pad), lambda b: (b, 0, 0)),
            ),
            compiler_params=compiler_params,
            cost_estimate=cost,
        )(adj_p, w_p)
    else:
        out_p = pl.pallas_call(
            _make_gcn_kernel(N),
            out_shape=out_shape,
            grid_spec=pltpu.PrefetchScalarGridSpec(
                num_scalar_prefetch=0,
                grid=grid,
                in_specs=[
                    pl.BlockSpec((tb, n_pad, in_pad), lambda b: (b, 0, 0)),
                    pl.BlockSpec((tb, n_pad, n_pad), lambda b: (b, 0, 0)),
                    pl.BlockSpec((in_pad, out_pad), lambda b: (0, 0)),
                ],
                out_specs=pl.BlockSpec((tb, n_pad, out_pad), lambda b: (b, 0, 0)),
            ),
            compiler_params=compiler_params,
            cost_estimate=cost,
        )(x_p, adj_p, w_p)

    out = out_p[:, :N, :out_dim]

    neg_loss = None
    if neg_penalty != 0:
        # TODO(synk): the PyTorch module appends this to self.losses (a Python
        # side effect); here it is computed in plain JAX glue and returned.
        neg_loss = neg_penalty * jnp.sum(jnp.maximum(1e-6 - kernel_w, 0.0))
    return out, neg_loss


def _reference_forward(x, adj, kernel_w):
    """Pure-JAX reference of the PyTorch forward (f32-accumulating matmuls)."""
    N = adj.shape[-1]
    eye = jnp.eye(N, dtype=jnp.float32)
    if x is None:
        axw = jnp.einsum("bij,jk->bik", adj, kernel_w,
                         preferred_element_type=jnp.float32)
    else:
        xw = jnp.einsum("bni,io->bno", x, kernel_w,
                        preferred_element_type=jnp.float32)
        axw = jnp.einsum("bij,bjo->bio", adj, xw.astype(adj.dtype),
                         preferred_element_type=jnp.float32)
    i_caxw = eye + C_CONST * axw
    y_relu = jnp.maximum(i_caxw, 0.0)
    col_mean = jnp.mean(y_relu, axis=-2, keepdims=True) + EPS
    y_norm = y_relu / col_mean
    return jax.nn.softplus(y_norm)


if __name__ == "__main__":
    # Small shapes consistent with the module: out_dim must equal N (eye add).
    B, N, IN_DIM, OUT_DIM = 2, 16, 16, 16
    NEG_PENALTY = 0.1

    key = jax.random.PRNGKey(0)
    kx, ka, kw = jax.random.split(key, 3)

    x = jax.random.normal(kx, (B, N, IN_DIM), dtype=jnp.float32)
    adj_raw = jax.random.uniform(ka, (B, N, N), dtype=jnp.float32)
    adj = 0.5 * (adj_raw + jnp.swapaxes(adj_raw, -1, -2))  # symmetric adjacency
    kernel_w = 0.1 * jax.random.normal(kw, (IN_DIM, OUT_DIM), dtype=jnp.float32)

    out, neg_loss = gcn_forward(x, adj, kernel_w, neg_penalty=NEG_PENALTY)
    out = jax.block_until_ready(out)
    assert out.shape == (B, N, OUT_DIM)

    # Reference uses the same bf16-cast matmul operands (f32 accumulation), so
    # remaining deltas are the approx reciprocal / transcendental paths.
    ref = _reference_forward(x.astype(jnp.bfloat16), adj.astype(jnp.bfloat16),
                             kernel_w.astype(jnp.bfloat16))
    assert jnp.allclose(out, ref, atol=2e-2, rtol=2e-2), \
        f"max abs err {float(jnp.max(jnp.abs(out - ref)))}"

    ref_loss = NEG_PENALTY * jnp.sum(jnp.maximum(1e-6 - kernel_w, 0.0))
    assert jnp.allclose(neg_loss, ref_loss, atol=1e-6)

    # x=None branch (requires in_dim == N).
    out_nx, _ = gcn_forward(None, adj, kernel_w, neg_penalty=0.0)
    out_nx = jax.block_until_ready(out_nx)
    ref_nx = _reference_forward(None, adj.astype(jnp.bfloat16),
                                kernel_w.astype(jnp.bfloat16))
    assert jnp.allclose(out_nx, ref_nx, atol=2e-2, rtol=2e-2)

    print("KERNEL_OK")
</pallas_src>

<mosaic_0001>
module attributes {stable_mosaic.version = 11 : i64} {
  func.func @kernel(%arg0: i32, %arg1: memref<2x128x128xbf16, #tpu.memory_space<vmem>>, %arg2: memref<2x128x128xbf16, #tpu.memory_space<vmem>>, %arg3: memref<128x128xbf16, #tpu.memory_space<vmem>>, %arg4: memref<2x128x128xf32, #tpu.memory_space<vmem>>) attributes {dimension_semantics = [#tpu.dimension_semantics<parallel>], iteration_bounds = array<i64: 1>, scalar_prefetch = 0 : i64, scratch_operands = 0 : i64, tpu.core_type = #tpu.core_type<tc>, window_params = [{transform_indices = @transform_0, window_bounds = array<i64: 2, 128, 128>}, {transform_indices = @transform_1, window_bounds = array<i64: 2, 128, 128>}, {pipeline_mode = #tpu.pipeline_mode<synchronous>, transform_indices = @transform_2, window_bounds = array<i64: 128, 128>}, {transform_indices = @transform_3, window_bounds = array<i64: 2, 128, 128>}]} {
    %c0 = arith.constant 0 : index
    %c0_0 = arith.constant 0 : index
    %c0_1 = arith.constant 0 : index
    %0 = vector.load %arg1[%c0, %c0_0, %c0_1] : memref<2x128x128xbf16, #tpu.memory_space<vmem>>, vector<2x128x128xbf16>
    %1 = vector.shape_cast %0 : vector<2x128x128xbf16> to vector<256x128xbf16>
    %c0_2 = arith.constant 0 : index
    %c0_3 = arith.constant 0 : index
    %2 = vector.load %arg3[%c0_2, %c0_3] : memref<128x128xbf16, #tpu.memory_space<vmem>>, vector<128x128xbf16>
    %cst = arith.constant dense<0.000000e+00> : vector<256x128xf32>
    %3 = tpu.matmul %1, %2, %cst {dimension_numbers = #tpu.dot_dimension_numbers<[1], [0], [0], [1], [0, 0, 1, 1], [], []>} : vector<256x128xbf16>, vector<128x128xbf16>, vector<256x128xf32> -> vector<256x128xf32>
    %4 = vector.shape_cast %3 : vector<256x128xf32> to vector<2x128x128xf32>
    %5 = arith.truncf %4 : vector<2x128x128xf32> to vector<2x128x128xbf16>
    %c0_4 = arith.constant 0 : index
    %c0_5 = arith.constant 0 : index
    %c0_6 = arith.constant 0 : index
    %6 = vector.load %arg2[%c0_4, %c0_5, %c0_6] : memref<2x128x128xbf16, #tpu.memory_space<vmem>>, vector<2x128x128xbf16>
    "tpu.trace_start"() <{level = 10 : i32, message = "bij,bjk->bik"}> : () -> ()
    %cst_7 = arith.constant dense<0.000000e+00> : vector<2x128x128xf32>
    %7 = tpu.matmul %6, %5, %cst_7 {dimension_numbers = #tpu.dot_dimension_numbers<[2], [1], [1], [2], [0, 0, 0, 1, 1, 2], [0], [0]>} : vector<2x128x128xbf16>, vector<2x128x128xbf16>, vector<2x128x128xf32> -> vector<2x128x128xf32>
    "tpu.trace_stop"() : () -> ()
    %cst_8 = arith.constant 8.500000e-01 : f32
    %8 = vector.broadcast %cst_8 : f32 to vector<2x128x128xf32>
    %9 = arith.mulf %8, %7 : vector<2x128x128xf32>
    %10 = tpu.iota {dimensions = array<i32: 0>} : vector<128x128xi32>
    %11 = tpu.iota {dimensions = array<i32: 1>} : vector<128x128xi32>
    %12 = arith.cmpi eq, %10, %11 : vector<128x128xi32>
    %cst_9 = arith.constant 1.000000e+00 : f32
    %13 = vector.broadcast %cst_9 : f32 to vector<2x128x128xf32>
    %14 = arith.addf %9, %13 : vector<2x128x128xf32>
    %15 = vector.shape_cast %12 : vector<128x128xi1> to vector<1x128x128xi1>
    %16 = vector.broadcast %15 : vector<1x128x128xi1> to vector<2x128x128xi1>
    %17 = arith.select %16, %14, %9 : vector<2x128x128xi1>, vector<2x128x128xf32>
    %cst_10 = arith.constant 0.000000e+00 : f32
    %18 = vector.broadcast %cst_10 : f32 to vector<2x128x128xf32>
    %19 = arith.maximumf %17, %18 : vector<2x128x128xf32>
    %cst_11 = arith.constant dense<0.000000e+00> : vector<2x128xf32>
    %20 = vector.multi_reduction <add>, %19, %cst_11 [1] : vector<2x128x128xf32> to vector<2x128xf32>
    %21 = vector.shape_cast %20 : vector<2x128xf32> to vector<2x1x128xf32>
    %cst_12 = arith.constant 6.250000e-02 : f32
    %22 = vector.broadcast %cst_12 : f32 to vector<2x1x128xf32>
    %23 = arith.mulf %21, %22 : vector<2x1x128xf32>
    %cst_13 = arith.constant 9.99999997E-7 : f32
    %24 = vector.broadcast %cst_13 : f32 to vector<2x1x128xf32>
    %25 = arith.addf %23, %24 : vector<2x1x128xf32>
    %26 = tpu.reciprocal %25 {approx = true} : vector<2x1x128xf32> -> vector<2x1x128xf32>
    %27 = vector.broadcast %26 : vector<2x1x128xf32> to vector<2x128x128xf32>
    %28 = arith.mulf %19, %27 : vector<2x128x128xf32>
    %cst_14 = arith.constant 0.000000e+00 : f32
    %29 = vector.broadcast %cst_14 : f32 to vector<2x128x128xf32>
    %30 = arith.maximumf %28, %29 : vector<2x128x128xf32>
    %31 = vector.broadcast %cst_14 : f32 to vector<2x128x128xf32>
    %32 = arith.subf %28, %31 : vector<2x128x128xf32>
    %33 = arith.cmpf one, %32, %32 : vector<2x128x128xf32>
    %34 = vector.broadcast %cst_14 : f32 to vector<2x128x128xf32>
    %35 = arith.addf %28, %34 : vector<2x128x128xf32>
    %36 = math.absf %32 : vector<2x128x128xf32>
    %cst_15 = arith.constant 0.000000e+00 : f32
    %37 = vector.broadcast %cst_15 : f32 to vector<2x128x128xf32>
    %38 = arith.subf %37, %36 : vector<2x128x128xf32>
    %39 = math.exp %38 : vector<2x128x128xf32>
    %40 = math.log1p %39 : vector<2x128x128xf32>
    %41 = arith.addf %30, %40 : vector<2x128x128xf32>
    %42 = arith.select %33, %35, %41 : vector<2x128x128xi1>, vector<2x128x128xf32>
    %c0_16 = arith.constant 0 : index
    %c0_17 = arith.constant 0 : index
    %c0_18 = arith.constant 0 : index
    %43 = vector.load %arg4[%c0_16, %c0_17, %c0_18] : memref<2x128x128xf32, #tpu.memory_space<vmem>>, vector<2x128x128xf32>
    tpu.vector_store %arg4[%c0_16, %c0_17, %c0_18], %42 {strides = array<i32>} : memref<2x128x128xf32, #tpu.memory_space<vmem>>, vector<2x128x128xf32>,
    return
  }
  func.func @transform_0(%arg0: i32) -> (i32, i32, i32) {
    %c0_i32 = arith.constant 0 : i32
    %c0_i32_0 = arith.constant 0 : i32
    %c0_i32_1 = arith.constant 0 : i32
    return %arg0, %c0_i32, %c0_i32_0 : i32, i32, i32
  }
  func.func @transform_1(%arg0: i32) -> (i32, i32, i32) {
    %c0_i32 = arith.constant 0 : i32
    %c0_i32_0 = arith.constant 0 : i32
    %c0_i32_1 = arith.constant 0 : i32
    return %arg0, %c0_i32, %c0_i32_0 : i32, i32, i32
  }
  func.func @transform_2(%arg0: i32) -> (i32, i32) {
    %c0_i32 = arith.constant 0 : i32
    %c0_i32_0 = arith.constant 0 : i32
    %c0_i32_1 = arith.constant 0 : i32
    return %c0_i32, %c0_i32_0 : i32, i32
  }
  func.func @transform_3(%arg0: i32) -> (i32, i32, i32) {
    %c0_i32 = arith.constant 0 : i32
    %c0_i32_0 = arith.constant 0 : i32
    %c0_i32_1 = arith.constant 0 : i32
    return %arg0, %c0_i32, %c0_i32_0 : i32, i32, i32
  }
}

</mosaic_0001>

<bundles_post_ra>
// kernel: tpu_custom_call.1
= control target key start
LH: loop header
LB: loop body
LE: loop exit
PB: predicated region body
PF: predicated region fallthrough
CT: control target
= control target key end

     0   :  { %8 = vsyncpa [#allocation3], 0  ;;  %s3681_s0 = inlined_call_operand.hbm [shape: bf16[2,128,128], index: 0, kind: input, shape index: {}]   ;;  %s3682_s1 = inlined_call_operand.hbm [shape: bf16[2,128,128], index: 1, kind: input, shape index: {}]   ;;  %s3683_s2 = inlined_call_operand.hbm [shape: bf16[128,128], index: 2, kind: input, shape index: {}]   ;;  %s3684_s3 = inlined_call_operand.hbm [shape: f32[2,128,128], index: 3, kind: output, shape index: {}]  }
   0x1   :  { %9 = vsyncpa [#allocation6], 0 }
   0x2   :  { %10 = vsyncpa [#allocation4], 0  ;;  %s2123_s12 = smov [#allocation5]   ;;  %s2124_s14 = smov [#allocation2]  }
   0x3   :  { %s28_s13 = sshll.u32 %s2123_s12, 4  ;;  %s16_s15 = sshll.u32 %s2124_s14, 4  ;;  %s29_s13 = int_to_ptr.vmem [resolvable:$true] %s28_s13  ;;  %s17_s15 = int_to_ptr.vmem [resolvable:$true] %s16_s15 }
   0x4   :  { %s2045_s16 = scalar_lea.vmem %s29_s13, 2048  ;;  %p2050_p1 = scmp.lt.s32.totalorder %s29_s13, %s29_s13 }
   0x5   :  { %p2046_p0 = scmp.ne.s32.totalorder %s29_s13, %s2045_s16  ;;  %p2051_p2 = scmp.lt.s32.totalorder %s2045_s16, %s2045_s16 }
   0x7   :  { %p2052_p3 = por %p2051_p2, %p2050_p1 }
   0x9   :  { %p2053_p4 = pnand %p2052_p3, %p2046_p0 }
   0xb   :  { %2056 = shalt.err (!%p2053_p4)
}
   0xc   :  { %s2125_s17 = smov 64   ;;  %s2126_s18 = smov 4  }
   0xd   :  { %34 = dma.hbm_to_vmem [thread:$0]  %s3682_s1, 2048, %s29_s13, [#allocation6], %s2125_s17, %s2125_s17, %s2126_s18  }
   0xe   :  { %s2065_s21 = scalar_lea.vmem %s17_s15, 2048  ;;  %p2070_p6 = scmp.lt.s32.totalorder %s17_s15, %s17_s15 }
   0xf   :  { %p2066_p5 = scmp.ne.s32.totalorder %s17_s15, %s2065_s21  ;;  %p2071_p7 = scmp.lt.s32.totalorder %s2065_s21, %s2065_s21 }
  0x11   :  { %p2072_p8 = por %p2071_p7, %p2070_p6 }
  0x13   :  { %p2073_p9 = pnand %p2072_p8, %p2066_p5 }
  0x15   :  { %2076 = shalt.err (!%p2073_p9)
}
  0x16   :  { %22 = dma.hbm_to_vmem [thread:$0]  %s3681_s0, 2048, %s17_s15, [#allocation3], %s2125_s17, %s2125_s17, %s2126_s18  }
  0x17   :  { %s2127_s24 = smov [#allocation7]  }
  0x18   :  { %s40_s25 = sshll.u32 %s2127_s24, 4  ;;  %s41_s25 = int_to_ptr.vmem [resolvable:$true] %s40_s25 }
  0x19   :  { %s2085_s26 = scalar_lea.vmem %s41_s25, 1024  ;;  %p2090_p11 = scmp.lt.s32.totalorder %s41_s25, %s41_s25 }
  0x1a   :  { %p2086_p10 = scmp.ne.s32.totalorder %s41_s25, %s2085_s26  ;;  %p2091_p12 = scmp.lt.s32.totalorder %s2085_s26, %s2085_s26 }
  0x1c   :  { %p2092_p13 = por %p2091_p12, %p2090_p11 }
  0x1e   :  { %p2093_p0 = pnand %p2092_p13, %p2086_p10 }
  0x20   :  { %2096 = shalt.err (!%p2093_p0)
}
  0x21   :  { %46 = dma.hbm_to_vmem [thread:$0]  %s3683_s2, 1024, %s41_s25, [#allocation6], %s2125_s17, %s2125_s17, %s2126_s18  }
  0x22   :  { %2117 = dma.done.wait [#allocation3], 2048  }
  0x23   :  { %2118 = vsyncadd [#allocation3], 4294965248 }
  0x24   :  { %2119 = dma.done.wait [#allocation6], 3072  }
  0x25   :  { %2120 = vsyncadd [#allocation6], 4294964224  ;;  %v1865_v0 = vld [vmem:[#allocation7 + $0x38] sm:$0xff]   ;;  %v1866_v1 = vld [vmem:[#allocation7 + $0x30] sm:$0xff]   ;;  %s2128_s0 = smov [#allocation8]  }
  0x26   :  { %1745 = vmatprep.subr.bf16.mxu0 %v1865_v0  ;;  %v1867_v2 = vld [vmem:[#allocation7 + $0x28] sm:$0xff]   ;;  %v1868_v3 = vld [vmem:[#allocation7 + $0x20] sm:$0xff]   ;;  %v1869_v5 = vld [vmem:[#allocation7 + $0x18] sm:$0xff]   ;;  %s1636_s2 = sshll.u32 %s2128_s0, 4  ;;  %s1637_s2 = int_to_ptr.vmem [resolvable:$true] %s1636_s2 }
  0x27   :  { %1746 = vmatpush3.bf16.msra.mxu0 %v1865_v0  ;;  %v1873_v4 = vld [vmem:[#allocation2] sm:$0xff]   ;;  %v1870_v6 = vld [vmem:[#allocation7 + $0x10] sm:$0xff]   ;;  %v1871_v7 = vld [vmem:[#allocation7 + $0x8] sm:$0xff]   ;;  %s2097_s28 = scalar_lea.vmem %s1637_s2, 4096  ;;  %p2102_p2 = scmp.lt.s32.totalorder %s1637_s2, %s1637_s2 }
  0x28   :  { %1747 = vmatprep.subr.bf16.mxu0 %v1866_v1  ;;  %1761 = vmatprep.mubr.bf16.mxu0 %v1873_v4  ;;  %v1872_v8 = vld [vmem:[#allocation7] sm:$0xff]   ;;  %v1874_v9 = vld [vmem:[#allocation2 + $0x8] sm:$0xff]   ;;  %v1875_v10 = vld [vmem:[#allocation2 + $0x10] sm:$0xff]   ;;  %p2098_p1 = scmp.ne.s32.totalorder %s1637_s2, %s2097_s28  ;;  %p2103_p3 = scmp.lt.s32.totalorder %s2097_s28, %s2097_s28 }
  0x29   :  { %v1876_v11 = vld [vmem:[#allocation2 + $0x18] sm:$0xff]   ;;  %v1877_v12 = vld [vmem:[#allocation2 + $0x20] sm:$0xff]   ;;  %v1878_v13 = vld [vmem:[#allocation2 + $0x28] sm:$0xff]  }
  0x2a   :  { %v1879_v14 = vld [vmem:[#allocation2 + $0x30] sm:$0xff]   ;;  %v1880_v15 = vld [vmem:[#allocation2 + $0x38] sm:$0xff]   ;;  %v1881_v16 = vld [vmem:[#allocation2 + $0x40] sm:$0xff]   ;;  %p2104_p4 = por %p2103_p3, %p2102_p2 }
  0x2b   :  { %1748 = vmatpush3.bf16.msra.mxu0 %v1866_v1  ;;  %v1882_v17 = vld [vmem:[#allocation2 + $0x48] sm:$0xff]   ;;  %v1883_v18 = vld [vmem:[#allocation2 + $0x50] sm:$0xff]   ;;  %v1884_v19 = vld [vmem:[#allocation2 + $0x58] sm:$0xff]  }
  0x2c   :  { %1749 = vmatprep.subr.bf16.mxu0 %v1867_v2  ;;  %v1885_v20 = vld [vmem:[#allocation2 + $0x60] sm:$0xff]   ;;  %v1886_v21 = vld [vmem:[#allocation2 + $0x68] sm:$0xff]   ;;  %v1887_v22 = vld [vmem:[#allocation2 + $0x70] sm:$0xff]   ;;  %p2105_p5 = pnand %p2104_p4, %p2098_p1 }
  0x2d   :  { %v1888_v23 = vld [vmem:[#allocation2 + $0x78] sm:$0xff]   ;;  %v1889_v24 = vld [vmem:[#allocation5] sm:$0xff]   ;;  %v1890_v63 = vld [vmem:[#allocation5 + $0x8] sm:$0xff]  }
  0x2e   :  { %1809 = vmatprep.mubr.bf16.mxu1 %v1889_v24  ;;  %v1891_v1 = vld [vmem:[#allocation5 + $0x10] sm:$0xff]   ;;  %v780_v24 = vlaneseq }
  0x2f   :  { %1750 = vmatpush3.bf16.msra.mxu0 %v1867_v2 }
  0x30   :  { %1751 = vmatprep.subr.bf16.mxu0 %v1868_v3 }
  0x33   :  { %1752 = vmatpush3.bf16.msra.mxu0 %v1868_v3 }
  0x34   :  { %1753 = vmatprep.subr.bf16.mxu0 %v1869_v5 }
  0x37   :  { %1754 = vmatpush3.bf16.msra.mxu0 %v1869_v5 }
  0x38   :  { %1755 = vmatprep.subr.bf16.mxu0 %v1870_v6 }
  0x3b   :  { %1756 = vmatpush3.bf16.msra.mxu0 %v1870_v6  ;;  %v1892_v6 = vld [vmem:[#allocation5 + $0x18] sm:$0xff]  }
  0x3c   :  { %1757 = vmatprep.subr.bf16.mxu0 %v1871_v7 }
  0x3f   :  { %1758 = vmatpush3.bf16.msra.mxu0 %v1871_v7  ;;  %v1893_v7 = vld [vmem:[#allocation5 + $0x20] sm:$0xff]  }
  0x40   :  { %1759 = vmatprep.subr.bf16.mxu0 %v1872_v8 }
  0x43   :  { %1760 = vmatpush3.bf16.msra.mxu0 %v1872_v8 }
  0x46   :  { %1762 = vmatmul.mubr.bf16.vlgmr.msra.gmra.mxu0 %v1874_v9 }
  0x47   :  { %1765 = vmatprep.mubr.bf16.mxu0 %v1875_v10  ;;  %v1894_v10 = vld [vmem:[#allocation5 + $0x28] sm:$0xff]  }
  0x4e   :  { %1766 = vmatmul.mubr.bf16.gmra.mxu0 %v1876_v11  ;;  %v1895_v11 = vld [vmem:[#allocation5 + $0x30] sm:$0xff]  }
  0x4f   :  { %1769 = vmatprep.mubr.bf16.mxu0 %v1877_v12 }
  0x56   :  { %1770 = vmatmul.mubr.bf16.gmra.mxu0 %v1878_v13 }
  0x57   :  { %1773 = vmatprep.mubr.bf16.mxu0 %v1879_v14  ;;  %v1896_v14 = vld [vmem:[#allocation5 + $0x38] sm:$0xff]  }
  0x5e   :  { %1774 = vmatmul.mubr.bf16.gmra.mxu0 %v1880_v15  ;;  %v1897_v15 = vld [vmem:[#allocation5 + $0x40] sm:$0xff]  }
  0x5f   :  { %1777 = vmatprep.mubr.bf16.mxu0 %v1881_v16 }
  0x66   :  { %1778 = vmatmul.mubr.bf16.gmra.mxu0 %v1882_v17  ;;  %v1898_v17 = vld [vmem:[#allocation5 + $0x48] sm:$0xff]  }
  0x67   :  { %1781 = vmatprep.mubr.bf16.mxu0 %v1883_v18  ;;  %v1899_v18 = vld [vmem:[#allocation5 + $0x50] sm:$0xff]  }
  0x6e   :  { %1782 = vmatmul.mubr.bf16.gmra.mxu0 %v1884_v19  ;;  %v1900_v19 = vld [vmem:[#allocation5 + $0x58] sm:$0xff]  }
  0x6f   :  { %1785 = vmatprep.mubr.bf16.mxu0 %v1885_v20  ;;  %v1901_v20 = vld [vmem:[#allocation5 + $0x60] sm:$0xff]  }
  0x76   :  { %1786 = vmatmul.mubr.bf16.gmra.mxu0 %v1886_v21  ;;  %v1902_v21 = vld [vmem:[#allocation5 + $0x68] sm:$0xff]  }
  0x77   :  { %1789 = vmatprep.mubr.bf16.mxu0 %v1887_v22  ;;  %v1903_v22 = vld [vmem:[#allocation5 + $0x70] sm:$0xff]  }
  0x7e   :  { %1790 = vmatmul.mubr.bf16.gmra.mxu0 %v1888_v23  ;;  %v1904_v23 = vld [vmem:[#allocation5 + $0x78] sm:$0xff]  }
 0x106   :  { %v1763_v25 = vpop.f32.mrf.mxu0 }
 0x108   :  { %v283_v26 = vpop.f32.mrf.mxu0 }
 0x10a   :  { %v1764_v27 = vpop.f32.mrf.mxu0 }
 0x10b   :  { %v411_v57 = vpack.c.bf16 %v1764_v27, %v1763_v25 }
 0x10c   :  { %v286_v28 = vpop.f32.mrf.mxu0 }
 0x10d   :  { %v410_v60 = vpack.c.bf16 %v286_v28, %v283_v26  ;;  %v2169_v26 = vshrl.u32 %v780_v24, 7 }
 0x10e   :  { %v1767_v29 = vpop.f32.mrf.mxu0 }
 0x110   :  { %v299_v30 = vpop.f32.mrf.mxu0 }
 0x112   :  { %v1768_v31 = vpop.f32.mrf.mxu0 }
 0x113   :  { %v413_v51 = vpack.c.bf16 %v1768_v31, %v1767_v29  ;;  %v2174_v31 = vand.u32 127, %v780_v24  ;;  %v2281_v24 = vadd.s32 88, %v2169_v26 }
 0x114   :  { %v302_v32 = vpop.f32.mrf.mxu0 }
 0x115   :  { %v412_v54 = vpack.c.bf16 %v302_v32, %v299_v30  ;;  %v2172_v30 = vadd.s32 16, %v2169_v26  ;;  %vm799_vm0 = vcmp.eq.s32.totalorder %v2169_v26, %v2174_v31  ;;  %vm810_vm11 = vcmp.eq.s32.totalorder %v2281_v24, %v2174_v31 }
 0x116   :  { %v1771_v33 = vpop.f32.mrf.mxu0 }
 0x117   :  { %vm801_vm1 = vcmp.eq.s32.totalorder %v2172_v30, %v2174_v31 }
 0x118   :  { %v315_v34 = vpop.f32.mrf.mxu0 }
 0x11a   :  { %v1772_v35 = vpop.f32.mrf.mxu0 }
 0x11b   :  { %v415_v45 = vpack.c.bf16 %v1772_v35, %v1771_v33  ;;  %v2177_v33 = vadd.s32 8, %v2169_v26 }
 0x11c   :  { %v318_v36 = vpop.f32.mrf.mxu0 }
 0x11d   :  { %v414_v48 = vpack.c.bf16 %v318_v36, %v315_v34  ;;  %v2182_v36 = vadd.s32 24, %v2169_v26  ;;  %vm800_vm2 = vcmp.eq.s32.totalorder %v2177_v33, %v2174_v31 }
 0x11e   :  { %v1775_v37 = vpop.f32.mrf.mxu0 }
 0x11f   :  { %vm802_vm3 = vcmp.eq.s32.totalorder %v2182_v36, %v2174_v31 }
 0x120   :  { %v331_v38 = vpop.f32.mrf.mxu0 }
 0x122   :  { %v1776_v39 = vpop.f32.mrf.mxu0 }
 0x123   :  { %v417_v40 = vpack.c.bf16 %v1776_v39, %v1775_v37 }
 0x124   :  { %v334_v41 = vpop.f32.mrf.mxu0 }
 0x125   :  { %v416_v42 = vpack.c.bf16 %v334_v41, %v331_v38  ;;  %1793 = vmatprep.subr.bf16.mxu1 %v417_v40  ;;  %v2189_v41 = vadd.s32 32, %v2169_v26 }
 0x126   :  { %v2160_v43 = vpop.f32.mrf.mxu0  ;;  %1794 = vmatpush3.bf16.msra.mxu1 %v417_v40 }
 0x127   :  { %1795 = vmatprep.subr.bf16.mxu1 %v416_v42  ;;  %vm803_vm4 = vcmp.eq.s32.totalorder %v2189_v41, %v2174_v31 }
 0x128   :  { %v2162_v44 = vpop.f32.mrf.mxu0 }
 0x12a   :  { %v1780_v46 = vpop.f32.mrf.mxu0  ;;  %1796 = vmatpush3.bf16.msra.mxu1 %v416_v42 }
 0x12b   :  { %1797 = vmatprep.subr.bf16.mxu1 %v415_v45  ;;  %v419_v13 = vpack.c.bf16 %v1780_v46, %v2160_v43 }
 0x12c   :  { %v2164_v47 = vpop.f32.mrf.mxu0 }
 0x12d   :  { %v418_v16 = vpack.c.bf16 %v2164_v47, %v2162_v44 }
 0x12e   :  { %v1783_v49 = vpop.f32.mrf.mxu0  ;;  %1798 = vmatpush3.bf16.msra.mxu1 %v415_v45  ;;  %v2199_v45 = vadd.s32 48, %v2169_v26 }
 0x12f   :  { %1799 = vmatprep.subr.bf16.mxu1 %v414_v48 }
 0x130   :  { %v363_v50 = vpop.f32.mrf.mxu0  ;;  %vm805_vm5 = vcmp.eq.s32.totalorder %v2199_v45, %v2174_v31 }
 0x132   :  { %v1784_v52 = vpop.f32.mrf.mxu0  ;;  %1800 = vmatpush3.bf16.msra.mxu1 %v414_v48 }
 0x133   :  { %1801 = vmatprep.subr.bf16.mxu1 %v413_v51  ;;  %v421_v9 = vpack.c.bf16 %v1784_v52, %v1783_v49 }
 0x134   :  { %v366_v53 = vpop.f32.mrf.mxu0 }
 0x135   :  { %v420_v12 = vpack.c.bf16 %v366_v53, %v363_v50 }
 0x136   :  { %v1787_v55 = vpop.f32.mrf.mxu0  ;;  %1802 = vmatpush3.bf16.msra.mxu1 %v413_v51 }
 0x137   :  { %1803 = vmatprep.subr.bf16.mxu1 %v412_v54 }
 0x138   :  { %v379_v56 = vpop.f32.mrf.mxu0 }
 0x13a   :  { %v1788_v58 = vpop.f32.mrf.mxu0  ;;  %1804 = vmatpush3.bf16.msra.mxu1 %v412_v54  ;;  %v2216_v54 = vadd.s32 40, %v2169_v26 }
 0x13b   :  { %1805 = vmatprep.subr.bf16.mxu1 %v411_v57  ;;  %v423_v5 = vpack.c.bf16 %v1788_v58, %v1787_v55 }
 0x13c   :  { %v382_v59 = vpop.f32.mrf.mxu0  ;;  %vm804_vm6 = vcmp.eq.s32.totalorder %v2216_v54, %v2174_v31 }
 0x13d   :  { %v422_v8 = vpack.c.bf16 %v382_v59, %v379_v56 }
 0x13e   :  { %v1791_v61 = vpop.f32.mrf.mxu0  ;;  %1806 = vmatpush3.bf16.msra.mxu1 %v411_v57 }
 0x13f   :  { %1807 = vmatprep.subr.bf16.mxu1 %v410_v60 }
 0x140   :  { %v395_v62 = vpop.f32.mrf.mxu0 }
 0x142   :  { %v1792_v0 = vpop.f32.mrf.mxu0  ;;  %1808 = vmatpush3.bf16.msra.mxu1 %v410_v60  ;;  %v2229_v60 = vadd.s32 56, %v2169_v26 }
 0x143   :  { %v425_v2 = vpack.c.bf16 %v1792_v0, %v1791_v61 }
 0x144   :  { %v398_v3 = vpop.f32.mrf.mxu0  ;;  %vm806_vm7 = vcmp.eq.s32.totalorder %v2229_v60, %v2174_v31 }
 0x145   :  { %v424_v4 = vpack.c.bf16 %v398_v3, %v395_v62  ;;  %1810 = vmatmul.mubr.bf16.vlgmr.msra.gmra.mxu1 %v1890_v63  ;;  %1825 = vmatprep.subr.bf16.mxu1 %v425_v2 }
 0x146   :  { %1826 = vmatpush3.bf16.msra.mxu1 %v425_v2  ;;  %1813 = vmatprep.mubr.bf16.mxu1 %v1891_v1 }
 0x147   :  { %1827 = vmatprep.subr.bf16.mxu1 %v424_v4 }
 0x14a   :  { %1828 = vmatpush3.bf16.msra.mxu1 %v424_v4  ;;  %v2244_v4 = vadd.s32 64, %v2169_v26 }
 0x14b   :  { %1829 = vmatprep.subr.bf16.mxu1 %v423_v5 }
 0x14c   :  { %vm807_vm8 = vcmp.eq.s32.totalorder %v2244_v4, %v2174_v31 }
 0x14d   :  { %1814 = vmatmul.mubr.bf16.gmra.mxu1 %v1892_v6 }
 0x14e   :  { %1830 = vmatpush3.bf16.msra.mxu1 %v423_v5  ;;  %1817 = vmatprep.mubr.bf16.mxu1 %v1893_v7 }
 0x14f   :  { %1831 = vmatprep.subr.bf16.mxu1 %v422_v8 }
 0x152   :  { %1832 = vmatpush3.bf16.msra.mxu1 %v422_v8 }
 0x153   :  { %1833 = vmatprep.subr.bf16.mxu1 %v421_v9 }
 0x155   :  { %1818 = vmatmul.mubr.bf16.gmra.mxu1 %v1894_v10 }
 0x156   :  { %1834 = vmatpush3.bf16.msra.mxu1 %v421_v9  ;;  %1821 = vmatprep.mubr.bf16.mxu1 %v1895_v11  ;;  %v2252_v9 = vadd.s32 80, %v2169_v26 }
 0x157   :  { %1835 = vmatprep.subr.bf16.mxu1 %v420_v12 }
 0x158   :  { %vm809_vm9 = vcmp.eq.s32.totalorder %v2252_v9, %v2174_v31 }
 0x15a   :  { %1836 = vmatpush3.bf16.msra.mxu1 %v420_v12 }
 0x15b   :  { %1837 = vmatprep.subr.bf16.mxu1 %v419_v13 }
 0x15d   :  { %1822 = vmatmul.mubr.bf16.gmra.mxu1 %v1896_v14 }
 0x15e   :  { %1838 = vmatpush3.bf16.msra.mxu1 %v419_v13  ;;  %1841 = vmatprep.mubr.bf16.mxu1 %v1897_v15 }
 0x15f   :  { %1839 = vmatprep.subr.bf16.mxu1 %v418_v16 }
 0x162   :  { %1840 = vmatpush3.bf16.msra.mxu1 %v418_v16 }
 0x165   :  { %1842 = vmatmul.mubr.bf16.vlgmr.msra.gmra.mxu1 %v1898_v17 }
 0x166   :  { %1845 = vmatprep.mubr.bf16.mxu1 %v1899_v18  ;;  %v2270_v18 = vadd.s32 72, %v2169_v26 }
 0x168   :  { %vm808_vm10 = vcmp.eq.s32.totalorder %v2270_v18, %v2174_v31 }
 0x16d   :  { %1846 = vmatmul.mubr.bf16.gmra.mxu1 %v1900_v19 }
 0x16e   :  { %1849 = vmatprep.mubr.bf16.mxu1 %v1901_v20 }
 0x175   :  { %1850 = vmatmul.mubr.bf16.gmra.mxu1 %v1902_v21 }
 0x176   :  { %1853 = vmatprep.mubr.bf16.mxu1 %v1903_v22 }
 0x17d   :  { %1854 = vmatmul.mubr.bf16.gmra.mxu1 %v1904_v23 }
 0x205   :  { %v1811_v25 = vpop.f32.mrf.mxu1 }
 0x206   :  { %v750_v28 = vmul.f32 0.85, %v1811_v25 }
 0x207   :  { %v540_v27 = vpop.f32.mrf.mxu1 }
 0x208   :  { %v748_v29 = vmul.f32 0.85, %v540_v27  ;;  %v817_v38 = vadd.f32 1.0, %v750_v28 }
 0x209   :  { %v1812_v32 = vpop.f32.mrf.mxu1 }
 0x20a   :  { %v815_v34 = vadd.f32 1.0, %v748_v29  ;;  %v751_v35 = vmul.f32 0.85, %v1812_v32  ;;  %v2204_v47 = vsel %vm801_vm1, %v817_v38, %v750_v28 }
 0x20b   :  { %v543_v37 = vpop.f32.mrf.mxu1  ;;  %v913_v58 = vmax.f32 %v2204_v47, 0.0 }
 0x20c   :  { %v749_v39 = vmul.f32 0.85, %v543_v37  ;;  %v2194_v42 = vsel %vm799_vm0, %v815_v34, %v748_v29  ;;  %v818_v43 = vadd.f32 1.0, %v751_v35  ;;  %v2296_v37 = vadd.s32 96, %v2169_v26 }
 0x20d   :  { %v1815_v40 = vpop.f32.mrf.mxu1  ;;  %v911_v51 = vmax.f32 %v2194_v42, 0.0 }
 0x20e   :  { %v816_v44 = vadd.f32 1.0, %v749_v39  ;;  %v754_v49 = vmul.f32 0.85, %v1815_v40  ;;  %v2221_v55 = vsel %vm802_vm3, %v818_v43, %v751_v35  ;;  %vm811_vm12 = vcmp.eq.s32.totalorder %v2296_v37, %v2174_v31 }
 0x20f   :  { %v556_v46 = vpop.f32.mrf.mxu1  ;;  %v914_v1 = vmax.f32 %v2221_v55, 0.0 }
 0x210   :  { %v2209_v48 = vsel %vm800_vm2, %v816_v44, %v749_v39  ;;  %v752_v50 = vmul.f32 0.85, %v556_v46  ;;  %v821_v62 = vadd.f32 1.0, %v754_v49  ;;  %v2304_v44 = vadd.s32 112, %v2169_v26 }
 0x211   :  { %v912_v52 = vmax.f32 %v2209_v48, 0.0  ;;  %v1816_v53 = vpop.f32.mrf.mxu1 }
 0x212   :  { %v819_v56 = vadd.f32 1.0, %v752_v50  ;;  %v755_v57 = vmul.f32 0.85, %v1816_v53  ;;  %v2257_v11 = vsel %vm805_vm5, %v821_v62, %v754_v49  ;;  %v2322_v62 = vadd.s32 104, %v2169_v26 }
 0x213   :  { %v943_v59 = vadd.f32 %v912_v52, %v911_v51  ;;  %v559_v61 = vpop.f32.mrf.mxu1  ;;  %v917_v22 = vmax.f32 %v2257_v11, 0.0  ;;  %vm813_vm13 = vcmp.eq.s32.totalorder %v2304_v44, %v2174_v31 }
 0x214   :  { %v2236_v63 = vsel %vm803_vm4, %v819_v56, %v752_v50  ;;  %v753_v0 = vmul.f32 0.85, %v559_v61  ;;  %v822_v5 = vadd.f32 1.0, %v755_v57  ;;  %vm812_vm14 = vcmp.eq.s32.totalorder %v2322_v62, %v2174_v31 }
 0x215   :  { %v944_v2 = vadd.f32 %v943_v59, %v913_v58  ;;  %v1819_v3 = vpop.f32.mrf.mxu1  ;;  %v915_v7 = vmax.f32 %v2236_v63, 0.0 }
 0x216   :  { %v820_v6 = vadd.f32 1.0, %v753_v0  ;;  %v758_v13 = vmul.f32 0.85, %v1819_v3  ;;  %v2275_v19 = vsel %vm806_vm7, %v822_v5, %v755_v57 }
 0x217   :  { %v945_v8 = vadd.f32 %v944_v2, %v914_v1  ;;  %v572_v10 = vpop.f32.mrf.mxu1  ;;  %v918_v32 = vmax.f32 %v2275_v19, 0.0 }
 0x218   :  { %v2262_v12 = vsel %vm804_vm6, %v820_v6, %v753_v0  ;;  %v756_v14 = vmul.f32 0.85, %v572_v10  ;;  %v825_v27 = vadd.f32 1.0, %v758_v13 }
 0x219   :  { %v946_v15 = vadd.f32 %v945_v8, %v915_v7  ;;  %v916_v16 = vmax.f32 %v2262_v12, 0.0  ;;  %v1820_v17 = vpop.f32.mrf.mxu1  ;;  %v2333_v8 = vadd.s32 120, %v2169_v26 }
 0x21a   :  { %v823_v20 = vadd.f32 1.0, %v756_v14  ;;  %v759_v21 = vmul.f32 0.85, %v1820_v17  ;;  %v2309_v49 = vsel %vm809_vm9, %v825_v27, %v758_v13 }
 0x21b   :  { %v947_v23 = vadd.f32 %v946_v15, %v916_v16  ;;  %v575_v25 = vpop.f32.mrf.mxu1  ;;  %v3689_v5 = vmax.f32 %v2309_v49, 0.0  ;;  %vm814_vm15 = vcmp.eq.s32.totalorder %v2333_v8, %v2174_v31  ;;  %v3822_v12 = vmax.f32 %v2309_v49, 0.0 }
 0x21c   :  { %v2288_v28 = vsel %vm807_vm8, %v823_v20, %v756_v14  ;;  %v757_v29 = vmul.f32 0.85, %v575_v25  ;;  %v826_v38 = vadd.f32 1.0, %v759_v21 }
 0x21d   :  { %v948_v34 = vadd.f32 %v947_v23, %v917_v22  ;;  %v1823_v35 = vpop.f32.mrf.mxu1  ;;  %v919_v40 = vmax.f32 %v2288_v28, 0.0 }
 0x21e   :  { %v824_v39 = vadd.f32 1.0, %v757_v29  ;;  %v762_v53 = vmul.f32 0.85, %v1823_v35  ;;  %v2327_v0 = vsel %vm810_vm11, %v826_v38, %v759_v21 }
 0x21f   :  { %v949_v43 = vadd.f32 %v948_v34, %v918_v32  ;;  %v588_v46 = vpop.f32.mrf.mxu1  ;;  %v3687_v17 = vmax.f32 %v2327_v0, 0.0  ;;  %v3824_v11 = vmax.f32 %v2327_v0, 0.0 }
 0x220   :  { %v2314_v50 = vsel %vm808_vm10, %v824_v39, %v757_v29  ;;  %v760_v56 = vmul.f32 0.85, %v588_v46  ;;  %v829_v13 = vadd.f32 1.0, %v762_v53 }
 0x221   :  { %v950_v57 = vadd.f32 %v949_v43, %v919_v40  ;;  %v3692_v59 = vmax.f32 %v2314_v50, 0.0  ;;  %v1824_v61 = vpop.f32.mrf.mxu1 }
 0x222   :  { %v827_v2 = vadd.f32 1.0, %v760_v56  ;;  %v763_v3 = vmul.f32 0.85, %v1824_v61  ;;  %v2355_v35 = vsel %vm813_vm13, %v829_v13, %v762_v53 }
 0x223   :  { %v951_v6 = vadd.f32 %v950_v57, %v3692_v59  ;;  %v591_v10 = vpop.f32.mrf.mxu1  ;;  %v3828_v28 = vmax.f32 %v2355_v35, 0.0 }
 0x224   :  { %v2338_v14 = vsel %vm811_vm12, %v827_v2, %v760_v56  ;;  %v761_v15 = vmul.f32 0.85, %v591_v10  ;;  %v830_v23 = vadd.f32 1.0, %v763_v3 }
 0x225   :  { %v952_v20 = vadd.f32 %v951_v6, %v3689_v5  ;;  %v1843_v21 = vpop.f32.mrf.mxu1  ;;  %v3686_v27 = vmax.f32 %v2338_v14, 0.0  ;;  %v3685_v6 = vmax.f32 %v2355_v35, 0.0  ;;  %v3826_v19 = vmax.f32 %v2338_v14, 0.0 }
 0x226   :  { %v828_v25 = vadd.f32 1.0, %v761_v15  ;;  %v766_v39 = vmul.f32 0.85, %v1843_v21  ;;  %v2368_v61 = vsel %vm814_vm15, %v830_v23, %v763_v3 }
 0x227   :  { %v953_v29 = vadd.f32 %v952_v20, %v3687_v17  ;;  %v685_v34 = vpop.f32.mrf.mxu1  ;;  %v3688_v21 = vmax.f32 %v2368_v61, 0.0 }
 0x228   :  { %v2360_v38 = vsel %vm812_vm14, %v828_v25, %v761_v15  ;;  %v764_v43 = vmul.f32 0.85, %v685_v34  ;;  %v833_v15 = vadd.f32 1.0, %v766_v39 }
 0x229   :  { %v954_v46 = vadd.f32 %v953_v29, %v3686_v27  ;;  %v924_v56 = vmax.f32 %v2360_v38, 0.0  ;;  %v1844_v57 = vpop.f32.mrf.mxu1 }
 0x22a   :  { %v831_v53 = vadd.f32 1.0, %v764_v43  ;;  %v767_v2 = vmul.f32 0.85, %v1844_v57 }
 0x22b   :  { %v955_v10 = vadd.f32 %v954_v46, %v924_v56  ;;  %v688_v13 = vpop.f32.mrf.mxu1 }
 0x22c   :  { %v765_v20 = vmul.f32 0.85, %v688_v13  ;;  %v2379_v3 = vsel %vm799_vm0, %v831_v53, %v764_v43  ;;  %v834_v23 = vadd.f32 1.0, %v767_v2  ;;  %v2386_v13 = vsel %vm801_vm1, %v833_v15, %v766_v39 }
 0x22d   :  { %v956_v25 = vadd.f32 %v955_v10, %v3685_v6  ;;  %v1847_v29 = vpop.f32.mrf.mxu1  ;;  %v3691_v53 = vmax.f32 %v2379_v3, 0.0  ;;  %v3696_v33 = vmax.f32 %v2386_v13, 0.0 }
 0x22e   :  { %v832_v34 = vadd.f32 1.0, %v765_v20  ;;  %v770_v6 = vmul.f32 0.85, %v1847_v29 }
 0x22f   :  { %v957_v57 = vadd.f32 %v956_v25, %v3688_v21  ;;  %v701_v46 = vpop.f32.mrf.mxu1  ;;  %v2398_v25 = vsel %vm802_vm3, %v834_v23, %v767_v2 }
 0x230   :  { %v2391_v10 = vsel %vm800_vm2, %v832_v34, %v765_v20  ;;  %v768_v26 = vmul.f32 0.85, %v701_v46  ;;  %v837_v34 = vadd.f32 1.0, %v770_v6  ;;  %v3693_v23 = vmax.f32 %v2398_v25, 0.0 }
 0x231   :  { %v958_v43 = vrot.slane %v957_v57, 4  ;;  %v3690_v27 = vmax.f32 %v2391_v10, 0.0  ;;  %v1848_v17 = vpop.f32.mrf.mxu1  ;;  %v3838_v35 = vmax.f32 %v2398_v25, 0.0 }
 0x232   :  { %v835_v30 = vadd.f32 1.0, %v768_v26  ;;  %v771_v39 = vmul.f32 0.85, %v1848_v17  ;;  %v2419_v41 = vsel %vm805_vm5, %v837_v34, %v770_v6 }
 0x233   :  { %v959_v15 = vadd.f32 %v958_v43, %v957_v57  ;;  %v964_v20 = vadd.f32 %v3690_v27, %v3691_v53  ;;  %v704_v29 = vpop.f32.mrf.mxu1  ;;  %v933_v54 = vmax.f32 %v2419_v41, 0.0 }
 0x234   :  { %v2408_v46 = vsel %vm803_vm4, %v835_v30, %v768_v26  ;;  %v769_v36 = vmul.f32 0.85, %v704_v29  ;;  %v838_v43 = vadd.f32 1.0, %v771_v39 }
 0x235   :  { %v960_v2 = vrot.slane %v959_v15, 2  ;;  %v965_v17 = vadd.f32 %v964_v20, %v3696_v33  ;;  %v1851_v57 = vpop.f32.mrf.mxu1  ;;  %v3694_v27 = vmax.f32 %v2408_v46, 0.0 }
 0x236   :  { %v836_v21 = vadd.f32 1.0, %v769_v36  ;;  %v774_v30 = vmul.f32 0.85, %v1851_v57  ;;  %v2432_v45 = vsel %vm806_vm7, %v838_v43, %v771_v39 }
 0x237   :  { %v961_v5 = vadd.f32 %v960_v2, %v959_v15  ;;  %v966_v53 = vadd.f32 %v965_v17, %v3693_v23  ;;  %v717_v59 = vpop.f32.mrf.mxu1  ;;  %v934_v60 = vmax.f32 %v2432_v45, 0.0 }
 0x238   :  { %v2424_v26 = vsel %vm804_vm6, %v836_v21, %v769_v36  ;;  %v772_v20 = vmul.f32 0.85, %v717_v59  ;;  %v841_v36 = vadd.f32 1.0, %v774_v30 }
 0x239   :  { %v962_v29 = vrot.slane %v961_v5, 1  ;;  %v967_v15 = vadd.f32 %v966_v53, %v3694_v27  ;;  %v3695_v2 = vmax.f32 %v2424_v26, 0.0  ;;  %v1852_v17 = vpop.f32.mrf.mxu1 }
 0x23a   :  { %v839_v6 = vadd.f32 1.0, %v772_v20  ;;  %v775_v34 = vmul.f32 0.85, %v1852_v17  ;;  %v2451_v4 = vsel %vm809_vm9, %v841_v36, %v774_v30 }
 0x23b   :  { %v963_v23 = vadd.f32 %v962_v29, %v961_v5  ;;  %v968_v59 = vadd.f32 %v967_v15, %v3695_v2  ;;  %v720_v21 = vpop.f32.mrf.mxu1  ;;  %v937_v18 = vmax.f32 %v2451_v4, 0.0 }
 0x23c   :  { %v2440_v53 = vsel %vm807_vm8, %v839_v6, %v772_v20  ;;  %v773_v57 = vmul.f32 0.85, %v720_v21  ;;  %v842_v43 = vadd.f32 1.0, %v775_v34 }
 0x23d   :  { %v985_v27 = vmul.f32 0.0625, %v963_v23  ;;  %v969_v39 = vadd.f32 %v968_v59, %v933_v54  ;;  %v1855_v5 = vpop.f32.mrf.mxu1  ;;  %v935_v15 = vmax.f32 %v2440_v53, 0.0 }
 0x23e   :  { %v840_v29 = vadd.f32 1.0, %v773_v57  ;;  %v778_v20 = vmul.f32 0.85, %v1855_v5  ;;  %v2464_v9 = vsel %vm810_vm11, %v842_v43, %v775_v34 }
 0x23f   :  { %v987_v17 = vadd.f32 1e-06, %v985_v27  ;;  %v970_v2 = vadd.f32 %v969_v39, %v934_v60  ;;  %v733_v33 = vpop.f32.mrf.mxu1 }
 0x240   :  { %v2456_v23 = vsel %vm808_vm10, %v840_v29, %v773_v57  ;;  %v776_v6 = vmul.f32 0.85, %v733_v33  ;;  %v845_v39 = vadd.f32 1.0, %v778_v20  ;;  %v938_v29 = vmax.f32 %v2464_v9, 0.0 }
 0x241   :  { %1905 = vrcp.f32 %v987_v17  ;;  %v971_v27 = vadd.f32 %v970_v2, %v935_v15  ;;  %v936_v59 = vmax.f32 %v2456_v23, 0.0  ;;  %v1856_v21 = vpop.f32.mrf.mxu1 }
 0x242   :  { %v843_v30 = vadd.f32 1.0, %v776_v6  ;;  %v779_v36 = vmul.f32 0.85, %v1856_v21  ;;  %v2483_v21 = vsel %vm813_vm13, %v845_v39, %v778_v20 }
 0x243   :  { %v972_v57 = vadd.f32 %v971_v27, %v936_v59  ;;  %v736_v33 = vpop.f32.mrf.mxu1 }
 0x244   :  { %v2472_v2 = vsel %vm811_vm12, %v843_v30, %v776_v6  ;;  %v777_v5 = vmul.f32 0.85, %v736_v33  ;;  %v846_v34 = vadd.f32 1.0, %v779_v36  ;;  %v941_v33 = vmax.f32 %v2483_v21, 0.0 }
 0x245   :  { %v973_v24 = vadd.f32 %v972_v57, %v937_v18  ;;  %v939_v17 = vmax.f32 %v2472_v2, 0.0 }
 0x246   :  { %v844_v43 = vadd.f32 1.0, %v777_v5  ;;  %v2496_v57 = vsel %vm814_vm15, %v846_v34, %v779_v36 }
 0x247   :  { %v974_v27 = vadd.f32 %v973_v24, %v938_v29  ;;  %v3697_v20 = vmax.f32 %v2496_v57, 0.0 }
 0x248   :  { %v2488_v37 = vsel %vm812_vm14, %v844_v43, %v777_v5 }
 0x249   :  { %v975_v6 = vadd.f32 %v974_v27, %v939_v17  ;;  %v940_v30 = vmax.f32 %v2488_v37, 0.0  ;;  %v3840_v37 = vmax.f32 %v2408_v46, 0.0 }
 0x24b   :  { %v976_v44 = vadd.f32 %v975_v6, %v940_v30 }
 0x24d   :  { %v977_v62 = vadd.f32 %v976_v44, %v941_v33 }
 0x24e   :  { %v1906_v39 = vpop.eup %1905 }
 0x24f   :  { %v2506_v5 = vmul.f32 %v1906_v39, %v924_v56  ;;  %v978_v31 = vadd.f32 %v977_v62, %v3697_v20  ;;  %v2512_v8 = vmul.f32 %v1906_v39, %v911_v51  ;;  %v2516_v36 = vmul.f32 %v1906_v39, %v912_v52 }
 0x250   :  { %v2520_v24 = vmul.f32 %v1906_v39, %v913_v58  ;;  %v2524_v38 = vmul.f32 %v1906_v39, %v914_v1  ;;  %v2528_v56 = vmul.f32 %v1906_v39, %v915_v7  ;;  %v2532_v42 = vmul.f32 %v1906_v39, %v916_v16 }
 0x251   :  { %3811 = vst [vmem:[#allocation12_spill] sm:$0xff] %v2512_v8  ;;  %3812 = vst [vmem:[#allocation13_spill] sm:$0xff] %v2516_v36  ;;  %v1132_v48 = vand.u32 2147483647, %v2506_v5  ;;  %v979_v51 = vrot.slane %v978_v31, 4  ;;  %v2537_v47 = vmul.f32 %v1906_v39, %v917_v22  ;;  %v2541_v52 = vmul.f32 %v1906_v39, %v918_v32 }
 0x252   :  { %3813 = vst [vmem:[#allocation14_spill] sm:$0xff] %v2520_v24  ;;  %3814 = vst [vmem:[#allocation15_spill] sm:$0xff] %v2524_v38  ;;  %v2545_v55 = vmul.f32 %v1906_v39, %v919_v40  ;;  %v3820_v58 = vmax.f32 %v2314_v50, 0.0  ;;  %v2553_v16 = vmul.f32 %v1906_v39, %v3822_v12  ;;  %v2557_v22 = vmul.f32 %v1906_v39, %v3824_v11 }
 0x253   :  { %3815 = vst [vmem:[#allocation16_spill] sm:$0xff] %v2528_v56  ;;  %3816 = vst [vmem:[#allocation17_spill] sm:$0xff] %v2532_v42  ;;  %v1164_v1 = vsub.f32 0.0, %v1132_v48  ;;  %v980_v7 = vadd.f32 %v979_v51, %v978_v31  ;;  %v2561_v32 = vmul.f32 %v1906_v39, %v3826_v19  ;;  %v2565_v40 = vmul.f32 %v1906_v39, %v3828_v28 }
 0x254   :  { %3817 = vst [vmem:[#allocation18_spill] sm:$0xff] %v2537_v47  ;;  %3818 = vst [vmem:[#allocation19_spill] sm:$0xff] %v2541_v52  ;;  %v2549_v63 = vmul.f32 %v1906_v39, %v3820_v58  ;;  %v3830_v50 = vmax.f32 %v2368_v61, 0.0  ;;  %v1126_v19 = vand.u32 2147483647, %v2541_v52  ;;  %v3832_v58 = vmax.f32 %v2379_v3, 0.0 }
 0x255   :  { %3819 = vst [vmem:[#allocation20_spill] sm:$0xff] %v2545_v55  ;;  %3823 = vst [vmem:[#allocation22_spill] sm:$0xff] %v2553_v16  ;;  %v1209_v43 = vmul.f32 1.442695, %v1164_v1  ;;  %v981_v49 = vrot.slane %v980_v7, 2  ;;  %v3836_v61 = vmax.f32 %v2386_v13, 0.0  ;;  %vm1068_vm0 = vcmp.ne.f32.partialorder %v2506_v5, %v2506_v5 }
 0x256   :  { %3821 = vst [vmem:[#allocation21_spill] sm:$0xff] %v2549_v63  ;;  %3825 = vst [vmem:[#allocation23_spill] sm:$0xff] %v2557_v22  ;;  %v2569_v34 = vmul.f32 %v1906_v39, %v3830_v50  ;;  %v1119_v50 = vand.u32 2147483647, %v2512_v8  ;;  %v1127_v11 = vand.u32 2147483647, %v2545_v55 }
 0x257   :  { %3827 = vst [vmem:[#allocation24_spill] sm:$0xff] %v2561_v32  ;;  %3829 = vst [vmem:[#allocation25_spill] sm:$0xff] %v2565_v40  ;;  %1907 = vpow2.f32 %v1209_v43  ;;  %v982_v27 = vadd.f32 %v981_v49, %v980_v7  ;;  %v1120_v43 = vand.u32 2147483647, %v2516_v36  ;;  %v1121_v49 = vand.u32 2147483647, %v2520_v24 }
 0x258   :  { %3831 = vst [vmem:[#allocation26_spill] sm:$0xff] %v2569_v34  ;;  %v1128_v12 = vand.u32 2147483647, %v2549_v63  ;;  %v1129_v7 = vand.u32 2147483647, %v2553_v16  ;;  %v3842_v3 = vmax.f32 %v2424_v26, 0.0 }
 0x259   :  { %v983_v6 = vrot.slane %v982_v27, 1  ;;  %v1131_v9 = vand.u32 2147483647, %v2561_v32 }
 0x25b   :  { %v984_v0 = vadd.f32 %v983_v6, %v982_v27  ;;  %v1122_v27 = vand.u32 2147483647, %v2524_v38  ;;  %v1123_v6 = vand.u32 2147483647, %v2528_v56 }
 0x25d   :  { %v986_v44 = vmul.f32 0.0625, %v984_v0  ;;  %v1124_v0 = vand.u32 2147483647, %v2532_v42  ;;  %v1155_v23 = vsub.f32 0.0, %v1123_v6  ;;  %v3877_v42 = vmov 0 }
 0x25f   :  { %v988_v62 = vadd.f32 1e-06, %v986_v44 }
 0x261   :  { %1909 = vrcp.f32 %v988_v62  ;;  %v3834_v62 = vmax.f32 %v2391_v10, 0.0 }
 0x264   :  { %v1908_v14 = vpop.eup %1907 }
 0x265   :  { %v1364_v31 = vadd.f32 1.0, %v1908_v14  ;;  %v1367_v44 = vmul.f32 -0.5, %v1908_v14 }
 0x267   :  { %1911 = vlog2.f32 %v1364_v31  ;;  %v1125_v31 = vand.u32 2147483647, %v2537_v47  ;;  %v1368_v13 = vadd.f32 1.0, %v1367_v44 }
 0x269   :  { %v1369_v2 = vmul.f32 %v1908_v14, %v1368_v13  ;;  %v1158_v13 = vsub.f32 0.0, %v1126_v19  ;;  %v1191_v19 = vmul.f32 1.442695, %v1155_v23 }
 0x26e   :  { %v1910_v28 = vpop.eup %1909 }
 0x26f   :  { %v2597_v1 = vmul.f32 %v1910_v28, %v940_v30  ;;  %v2601_v51 = vmul.f32 %v1910_v28, %v3832_v58  ;;  %v2605_v39 = vmul.f32 %v1910_v28, %v3834_v62  ;;  %v2609_v48 = vmul.f32 %v1910_v28, %v3836_v61 }
 0x270   :  { %v2613_v20 = vmul.f32 %v1910_v28, %v3838_v35  ;;  %v2617_v30 = vmul.f32 %v1910_v28, %v3840_v37  ;;  %v2621_v58 = vmul.f32 %v1910_v28, %v3842_v3  ;;  %v2625_v10 = vmul.f32 %v1910_v28, %v933_v54 }
 0x271   :  { %3833 = vst [vmem:[#allocation27_spill] sm:$0xff] %v2601_v51  ;;  %3835 = vst [vmem:[#allocation28_spill] sm:$0xff] %v2605_v39  ;;  %v1370_v61 = vand.u32 2147483647, %v1908_v14  ;;  %v1148_v25 = vand.u32 2147483647, %v2597_v1  ;;  %v2632_v46 = vmul.f32 %v1910_v28, %v934_v60  ;;  %v2636_v26 = vmul.f32 %v1910_v28, %v935_v15 }
 0x272   :  { %3837 = vst [vmem:[#allocation29_spill] sm:$0xff] %v2609_v48  ;;  %3839 = vst [vmem:[#allocation30_spill] sm:$0xff] %v2613_v20  ;;  %v2640_v41 = vmul.f32 %v1910_v28, %v936_v59  ;;  %v2644_v54 = vmul.f32 %v1910_v28, %v937_v18  ;;  %v2648_v35 = vmul.f32 %v1910_v28, %v938_v29  ;;  %v3852_v60 = vmax.f32 %v2496_v57, 0.0 }
 0x273   :  { %3841 = vst [vmem:[#allocation31_spill] sm:$0xff] %v2617_v30  ;;  %3843 = vst [vmem:[#allocation32_spill] sm:$0xff] %v2621_v58  ;;  %v1180_v44 = vsub.f32 0.0, %v1148_v25  ;;  %v2652_v45 = vmul.f32 %v1910_v28, %v939_v17  ;;  %v2656_v53 = vmul.f32 %v1910_v28, %v941_v33  ;;  %v1130_v59 = vand.u32 2147483647, %v2557_v22 }
 0x274   :  { %3844 = vst [vmem:[#allocation33_spill] sm:$0xff] %v2625_v10  ;;  %3845 = vst [vmem:[#allocation34_spill] sm:$0xff] %v2632_v46  ;;  %v2660_v15 = vmul.f32 %v1910_v28, %v3852_v60  ;;  %v1912_v4 = vpop.eup %1911  ;;  %v1151_v18 = vsub.f32 0.0, %v1119_v50  ;;  %v1152_v62 = vsub.f32 0.0, %v1120_v43  ;;  %vm1371_vm1 = vcmp.lt.f32.partialorder %v1370_v61, 0.0004427343 }
 0x275   :  { %3846 = vst [vmem:[#allocation35_spill] sm:$0xff] %v2636_v26  ;;  %3847 = vst [vmem:[#allocation36_spill] sm:$0xff] %v2640_v41  ;;  %v1366_v29 = vmul.f32 0.6931472, %v1912_v4  ;;  %v1241_v17 = vmul.f32 1.442695, %v1180_v44  ;;  %vm1084_vm2 = vcmp.ne.f32.partialorder %v2597_v1, %v2597_v1 }
 0x276   :  { %3848 = vst [vmem:[#allocation37_spill] sm:$0xff] %v2644_v54  ;;  %3849 = vst [vmem:[#allocation38_spill] sm:$0xff] %v2648_v35  ;;  %v1133_v33 = vand.u32 2147483647, %v2565_v40  ;;  %v1153_v57 = vsub.f32 0.0, %v1121_v49  ;;  %v1154_v3 = vsub.f32 0.0, %v1122_v27 }
 0x277   :  { %3850 = vst [vmem:[#allocation39_spill] sm:$0xff] %v2652_v45  ;;  %3851 = vst [vmem:[#allocation40_spill] sm:$0xff] %v2656_v53  ;;  %v1372_v28 = vsel %vm1371_vm1, %v1369_v2, %v1366_v29  ;;  %1913 = vpow2.f32 %v1241_v17  ;;  %v1134_v37 = vand.u32 2147483647, %v2569_v34  ;;  %v3854_v25 = vmax.f32 %v2506_v5, 0.0 }
 0x278   :  { %3853 = vst [vmem:[#allocation41_spill] sm:$0xff] %v2660_v15  ;;  %v1156_v50 = vsub.f32 0.0, %v1124_v0  ;;  %v1183_v4 = vmul.f32 1.442695, %v1151_v18  ;;  %v1157_v14 = vsub.f32 0.0, %v1125_v31  ;;  %v1159_v43 = vsub.f32 0.0, %v1127_v11 }
 0x279   :  { %v1548_v60 = vadd.f32 %v1372_v28, %v3854_v25  ;;  %v1185_v61 = vmul.f32 1.442695, %v1152_v62  ;;  %v1160_v44 = vsub.f32 0.0, %v1128_v12  ;;  %v1161_v29 = vsub.f32 0.0, %v1129_v7 }
 0x27a   :  { %v1187_v2 = vmul.f32 1.442695, %v1153_v57  ;;  %v1162_v27 = vsub.f32 0.0, %v1130_v59  ;;  %v1163_v17 = vsub.f32 0.0, %v1131_v9  ;;  %v1165_v21 = vsub.f32 0.0, %v1133_v33 }
 0x27b   :  { %v1580_v49 = vsel %vm1068_vm0, %v2506_v5, %v1548_v60  ;;  %v1189_v28 = vmul.f32 1.442695, %v1154_v3  ;;  %v1166_v0 = vsub.f32 0.0, %v1134_v37  ;;  %1915 = vpow2.f32 %v1183_v4 }
 0x27c   :  { %1612 = vst [vmem:[#allocation8 + $0x68] sm:$0xff] %v1580_v49  ;;  %1917 = vpow2.f32 %v1185_v61  ;;  %v1193_v11 = vmul.f32 1.442695, %v1156_v50  ;;  %v1195_v31 = vmul.f32 1.442695, %v1157_v14 }
 0x27d   :  { %v1197_v18 = vmul.f32 1.442695, %v1158_v13  ;;  %1919 = vpow2.f32 %v1187_v2  ;;  %v1199_v62 = vmul.f32 1.442695, %v1159_v43  ;;  %v1201_v5 = vmul.f32 1.442695, %v1160_v44 }
 0x27e   :  { %v1203_v12 = vmul.f32 1.442695, %v1161_v29  ;;  %1921 = vpow2.f32 %v1189_v28  ;;  %v1205_v7 = vmul.f32 1.442695, %v1162_v27  ;;  %v1207_v57 = vmul.f32 1.442695, %v1163_v17 }
 0x27f   :  { %v1211_v59 = vmul.f32 1.442695, %v1165_v21  ;;  %1923 = vpow2.f32 %v1191_v19  ;;  %v1213_v37 = vmul.f32 1.442695, %v1166_v0  ;;  %v1135_v60 = vand.u32 2147483647, %v2601_v51 }
 0x280   :  { %v1136_v21 = vand.u32 2147483647, %v2605_v39  ;;  %1925 = vpow2.f32 %v1193_v11  ;;  %v1137_v43 = vand.u32 2147483647, %v2609_v48  ;;  %v1138_v29 = vand.u32 2147483647, %v2613_v20 }
 0x281   :  { %1927 = vpow2.f32 %v1195_v31  ;;  %v1139_v27 = vand.u32 2147483647, %v2617_v30  ;;  %v1167_v17 = vsub.f32 0.0, %v1135_v60  ;;  %v1140_v0 = vand.u32 2147483647, %v2621_v58 }
 0x282   :  { %1929 = vpow2.f32 %v1197_v18  ;;  %v1168_v19 = vsub.f32 0.0, %v1136_v21  ;;  %v1141_v11 = vand.u32 2147483647, %v2625_v10  ;;  %v1142_v31 = vand.u32 2147483647, %v2632_v46 }
 0x283   :  { %1931 = vpow2.f32 %v1199_v62  ;;  %v1169_v44 = vsub.f32 0.0, %v1137_v43  ;;  %v1143_v18 = vand.u32 2147483647, %v2636_v26  ;;  %v1144_v49 = vand.u32 2147483647, %v2640_v41 }
 0x284   :  { %v2687_v61 = vpop.eup %1913  ;;  %1933 = vpow2.f32 %v1201_v5  ;;  %v1170_v13 = vsub.f32 0.0, %v1138_v29  ;;  %v1145_v62 = vand.u32 2147483647, %v2644_v54  ;;  %v1171_v28 = vsub.f32 0.0, %v1139_v27 }
 0x285   :  { %v1508_v2 = vadd.f32 1.0, %v2687_v61  ;;  %v1215_v21 = vmul.f32 1.442695, %v1167_v17  ;;  %v1172_v14 = vsub.f32 0.0, %v1140_v0  ;;  %v1217_v43 = vmul.f32 1.442695, %v1168_v19 }
 0x286   :  { %v1147_v50 = vand.u32 2147483647, %v2652_v45  ;;  %v1173_v29 = vsub.f32 0.0, %v1141_v11  ;;  %v1511_v27 = vmul.f32 -0.5, %v2687_v61  ;;  %v1221_v17 = vmul.f32 1.442695, %v1170_v13 }
 0x287   :  { %1935 = vlog2.f32 %v1508_v2  ;;  %v1146_v2 = vand.u32 2147483647, %v2648_v35  ;;  %v1149_v0 = vand.u32 2147483647, %v2656_v53  ;;  %v1223_v19 = vmul.f32 1.442695, %v1171_v28 }
 0x288   :  { %1937 = vpow2.f32 %v1203_v12  ;;  %v2700_v60 = vpop.eup %1915  ;;  %v1219_v12 = vmul.f32 1.442695, %v1169_v44  ;;  %v1150_v23 = vand.u32 2147483647, %v2660_v15  ;;  %v1176_v33 = vsub.f32 0.0, %v1144_v49 }
 0x289   :  { %1939 = vpow2.f32 %v1205_v7  ;;  %v2703_v5 = vpop.eup %1917  ;;  %v1174_v7 = vsub.f32 0.0, %v1142_v31  ;;  %v1177_v11 = vsub.f32 0.0, %v1145_v62  ;;  %v1178_v6 = vsub.f32 0.0, %v1146_v2 }
 0x28a   :  { %1941 = vpow2.f32 %v1207_v57  ;;  %v2706_v4 = vpop.eup %1919  ;;  %v1175_v57 = vsub.f32 0.0, %v1143_v18  ;;  %v1227_v31 = vmul.f32 1.442695, %v1173_v29  ;;  %v1512_v13 = vadd.f32 1.0, %v1511_v27 }
 0x28b   :  { %1943 = vpow2.f32 %v1211_v59  ;;  %v2709_v25 = vpop.eup %1921  ;;  %v1225_v59 = vmul.f32 1.442695, %v1172_v14  ;;  %v1514_v9 = vand.u32 2147483647, %v2687_v61  ;;  %v1229_v18 = vmul.f32 1.442695, %v1174_v7 }
 0x28c   :  { %1945 = vpow2.f32 %v1213_v37  ;;  %v2712_v3 = vpop.eup %1923  ;;  %v1179_v49 = vsub.f32 0.0, %v1147_v50  ;;  %v1231_v28 = vmul.f32 1.442695, %v1175_v57  ;;  %v1233_v29 = vmul.f32 1.442695, %v1176_v33 }
 0x28d   :  { %1947 = vpow2.f32 %v1215_v21  ;;  %v2716_v44 = vpop.eup %1925  ;;  %v1182_v7 = vsub.f32 0.0, %v1150_v23  ;;  %v1513_v14 = vmul.f32 %v2687_v61, %v1512_v13  ;;  %vm2733_vm3 = vcmp.lt.f32.partialorder %v1514_v9, 0.0004427343 }
 0x28e   :  { %1949 = vpow2.f32 %v1217_v43  ;;  %v2718_v37 = vpop.eup %1927  ;;  %v1181_v43 = vsub.f32 0.0, %v1149_v0  ;;  %v1237_v57 = vmul.f32 1.442695, %v1178_v6  ;;  %v1239_v33 = vmul.f32 1.442695, %v1179_v49 }
 0x28f   :  { %1951 = vpow2.f32 %v1219_v12  ;;  %v2721_v21 = vpop.eup %1929  ;;  %v1268_v9 = vmul.f32 -0.5, %v2706_v4  ;;  %v1277_v50 = vmul.f32 -0.5, %v2709_v25  ;;  %v1301_v15 = vadd.f32 1.0, %v2718_v37 }
 0x290   :  { %1953 = vpow2.f32 %v1221_v17  ;;  %v2726_v62 = vpop.eup %1931  ;;  %v1235_v17 = vmul.f32 1.442695, %v1177_v11  ;;  %v1243_v23 = vmul.f32 1.442695, %v1181_v43  ;;  %v1259_v11 = vmul.f32 -0.5, %v2703_v5 }
 0x291   :  { %1955 = vpow2.f32 %v1223_v19  ;;  %v2729_v12 = vpop.eup %1933  ;;  %v1256_v43 = vadd.f32 1.0, %v2703_v5  ;;  %v1298_v46 = vand.u32 2147483647, %v2716_v44  ;;  %v3861_v22 = vand.u32 2147483647, %v2700_v60 }
 0x292   :  { %1957 = vpow2.f32 %v1225_v59  ;;  %v1250_v59 = vmul.f32 -0.5, %v2700_v60  ;;  %v1328_v41 = vadd.f32 1.0, %v2729_v12 }
 0x293   :  { %1959 = vpow2.f32 %v1227_v31  ;;  %vm2840_vm4 = vcmp.lt.f32.partialorder %v3861_v22, 0.0004427343  ;;  %vm2880_vm9 = vcmp.lt.f32.partialorder %v1298_v46, 0.0004427343 }
 0x294   :  { %v1936_v54 = vpop.eup %1935  ;;  %1961 = vpow2.f32 %v1229_v18  ;;  %v3857_v18 = vmax.f32 %v2597_v1, 0.0  ;;  %v1251_v2 = vadd.f32 1.0, %v1250_v59 }
 0x295   :  { %v2737_v19 = vpop.eup %1937  ;;  %v1510_v0 = vmul.f32 0.6931472, %v1936_v54  ;;  %1963 = vpow2.f32 %v1231_v28  ;;  %v1245_v54 = vmul.f32 1.442695, %v1182_v7  ;;  %v1247_v28 = vadd.f32 1.0, %v2700_v60 }
 0x296   :  { %v2740_v27 = vpop.eup %1939  ;;  %1965 = vpow2.f32 %v1233_v29 }
 0x297   :  { %v2744_v61 = vpop.eup %1941  ;;  %v1516_v6 = vsel %vm2733_vm3, %v1513_v14, %v1510_v0  ;;  %1967 = vpow2.f32 %v1235_v17  ;;  %v1265_v14 = vadd.f32 1.0, %v2706_v4  ;;  %v1269_v0 = vadd.f32 1.0, %v1268_v9 }
 0x298   :  { %v2749_v13 = vpop.eup %1943  ;;  %v1564_v49 = vadd.f32 %v1516_v6, %v3857_v18  ;;  %1969 = vpow2.f32 %v1237_v57  ;;  %v1260_v57 = vadd.f32 1.0, %v1259_v11  ;;  %v1274_v18 = vadd.f32 1.0, %v2709_v25 }
 0x299   :  { %v2755_v29 = vpop.eup %1945  ;;  %1971 = vpow2.f32 %v1239_v33  ;;  %v2778_v9 = vmul.f32 %v2700_v60, %v1251_v2  ;;  %v1280_v2 = vand.u32 2147483647, %v2709_v25  ;;  %v1355_v20 = vadd.f32 1.0, %v2744_v61 }
 0x29a   :  { %v2759_v17 = vpop.eup %1947  ;;  %v1596_v7 = vsel %vm1084_vm2, %v2597_v1, %v1564_v49  ;;  %1973 = vpow2.f32 %v1243_v23  ;;  %v1283_v1 = vadd.f32 1.0, %v2712_v3  ;;  %v1286_v23 = vmul.f32 -0.5, %v2712_v3 }
 0x29b   :  { %v2765_v6 = vpop.eup %1949  ;;  %1628 = vst [vmem:[#allocation8 + $0xe8] sm:$0xff] %v1596_v7  ;;  %1975 = vpow2.f32 %v1245_v54  ;;  %v1278_v54 = vadd.f32 1.0, %v1277_v50  ;;  %v1292_v49 = vadd.f32 1.0, %v2716_v44  ;;  %v2784_v59 = vmul.f32 %v2703_v5, %v1260_v57 }
 0x29c   :  { %v2770_v31 = vpop.eup %1951  ;;  %1977 = vlog2.f32 %v1247_v28  ;;  %v2787_v28 = vmul.f32 %v2706_v4, %v1269_v0  ;;  %v1310_v50 = vadd.f32 1.0, %v2721_v21  ;;  %v1287_v57 = vadd.f32 1.0, %v1286_v23 }
 0x29d   :  { %v2775_v11 = vpop.eup %1953  ;;  %1979 = vlog2.f32 %v1256_v43  ;;  %v1295_v43 = vmul.f32 -0.5, %v2716_v44  ;;  %v1319_v0 = vadd.f32 1.0, %v2726_v62  ;;  %v2802_v35 = vmul.f32 %v2709_v25, %v1278_v54 }
 0x29e   :  { %v2781_v7 = vpop.eup %1955  ;;  %1981 = vlog2.f32 %v1265_v14  ;;  %3858 = vst [vmem:[#allocation42_spill] sm:$0xff] %v2787_v28  ;;  %v1289_v14 = vand.u32 2147483647, %v2712_v3  ;;  %v1337_v23 = vadd.f32 1.0, %v2737_v19  ;;  %v1322_v25 = vmul.f32 -0.5, %v2726_v62 }
 0x29f   :  { %v2790_v33 = vpop.eup %1957  ;;  %1983 = vlog2.f32 %v1274_v18  ;;  %v1304_v18 = vmul.f32 -0.5, %v2718_v37  ;;  %v1296_v58 = vadd.f32 1.0, %v1295_v43  ;;  %v1346_v54 = vadd.f32 1.0, %v2740_v27 }
 0x2a0   :  { %v2795_v53 = vpop.eup %1959  ;;  %1985 = vlog2.f32 %v1283_v1  ;;  %v1313_v1 = vmul.f32 -0.5, %v2721_v21  ;;  %v2818_v30 = vmul.f32 %v2712_v3, %v1287_v57  ;;  %v1307_v43 = vand.u32 2147483647, %v2718_v37 }
 0x2a1   :  { %v2799_v45 = vpop.eup %1961  ;;  %1987 = vlog2.f32 %v1292_v49  ;;  %v1305_v39 = vadd.f32 1.0, %v1304_v18  ;;  %v1349_v3 = vmul.f32 -0.5, %v2740_v27  ;;  %v1373_v57 = vadd.f32 1.0, %v2749_v13 }
 0x2a2   :  { %v2806_v26 = vpop.eup %1963  ;;  %1989 = vlog2.f32 %v1301_v15  ;;  %v1331_v15 = vmul.f32 -0.5, %v2729_v12  ;;  %v1314_v34 = vadd.f32 1.0, %v1313_v1  ;;  %v2833_v40 = vmul.f32 %v2716_v44, %v1296_v58 }
 0x2a3   :  { %v2811_v10 = vpop.eup %1965  ;;  %1991 = vlog2.f32 %v1310_v50  ;;  %v1340_v50 = vmul.f32 -0.5, %v2737_v19  ;;  %v1316_v18 = vand.u32 2147483647, %v2721_v21  ;;  %v1323_v32 = vadd.f32 1.0, %v1322_v25 }
 0x2a4   :  { %v2815_v49 = vpop.eup %1967  ;;  %1993 = vlog2.f32 %v1319_v0  ;;  %3859 = vst [vmem:[#allocation43_spill] sm:$0xff] %v2833_v40  ;;  %v1358_v16 = vmul.f32 -0.5, %v2744_v61  ;;  %v1382_v63 = vadd.f32 1.0, %v2755_v29  ;;  %v3864_v44 = vand.u32 2147483647, %v2703_v5 }
 0x2a5   :  { %v2822_v48 = vpop.eup %1969  ;;  %1995 = vlog2.f32 %v1328_v41  ;;  %v1341_v22 = vadd.f32 1.0, %v1340_v50  ;;  %v1376_v60 = vmul.f32 -0.5, %v2749_v13  ;;  %v2863_v5 = vmul.f32 %v2721_v21, %v1314_v34 }
 0x2a6   :  { %v2826_v51 = vpop.eup %1971  ;;  %1997 = vlog2.f32 %v1337_v23  ;;  %v1332_v23 = vadd.f32 1.0, %v1331_v15  ;;  %vm2848_vm5 = vcmp.lt.f32.partialorder %v3864_v44, 0.0004427343  ;;  %v1325_v44 = vand.u32 2147483647, %v2726_v62 }
 0x2a7   :  { %v2830_v0 = vpop.eup %1973  ;;  %1999 = vlog2.f32 %v1346_v54  ;;  %v2853_v54 = vmul.f32 %v2718_v37, %v1305_v39  ;;  %v1350_v52 = vadd.f32 1.0, %v1349_v3  ;;  %vm2866_vm7 = vcmp.lt.f32.partialorder %v1280_v2, 0.0004427343  ;;  %v3974_v37 = vld [vmem:[#allocation18_spill] sm:$0xff] }
 0x2a8   :  { %v2836_v41 = vpop.eup %1975  ;;  %2001 = vlog2.f32 %v1355_v20  ;;  %v3867_v20 = vand.u32 2147483647, %v2706_v4  ;;  %vm2870_vm8 = vcmp.lt.f32.partialorder %v1289_v14, 0.0004427343  ;;  %v2875_v4 = vmul.f32 %v2726_v62, %v1323_v32 }
 0x2a9   :  { %3860 = vst [vmem:[#allocation44_spill] sm:$0xff] %v2836_v41  ;;  %v1978_v58 = vpop.eup %1977  ;;  %2003 = vlog2.f32 %v1373_v57  ;;  %v1334_v57 = vand.u32 2147483647, %v2729_v12  ;;  %v1343_v34 = vand.u32 2147483647, %v2737_v19  ;;  %v1385_v21 = vmul.f32 -0.5, %v2755_v29 }
 0x2aa   :  { %v1980_v15 = vpop.eup %1979  ;;  %vm2858_vm6 = vcmp.lt.f32.partialorder %v3867_v20, 0.0004427343  ;;  %2005 = vlog2.f32 %v1382_v63  ;;  %v3874_v63 = vmov 0  ;;  %v2885_v2 = vmul.f32 %v2729_v12, %v1332_v23  ;;  %v3997_v41 = vld [vmem:[#allocation24_spill] sm:$0xff] }
 0x2ab   :  { %v1982_v39 = vpop.eup %1981  ;;  %v3875_v63 = vsel %vm2880_vm9, 4294967295, %v3874_v63  ;;  %v1352_v14 = vand.u32 2147483647, %v2740_v27  ;;  %v1359_v20 = vadd.f32 1.0, %v1358_v16  ;;  %v1391_v32 = vadd.f32 1.0, %v2759_v17 }
 0x2ac   :  { %v1984_v3 = vpop.eup %1983  ;;  %3876 = vst [vmem:[#allocation45_spill] sm:$0xff] %v3875_v63  ;;  %v2889_v47 = vmul.f32 0.6931472, %v1978_v58  ;;  %vm2891_vm10 = vcmp.lt.f32.partialorder %v1307_v43, 0.0004427343  ;;  %v2896_v46 = vmul.f32 %v2737_v19, %v1341_v22  ;;  %v1377_v38 = vadd.f32 1.0, %v1376_v60 }
 0x2ad   :  { %v1986_v62 = vpop.eup %1985  ;;  %v3878_v42 = vsel %vm2891_vm10, 4294967295, %v3877_v42  ;;  %v1361_v56 = vand.u32 2147483647, %v2744_v61  ;;  %v2899_v23 = vmul.f32 0.6931472, %v1980_v15  ;;  %v2906_v58 = vmul.f32 %v2740_v27, %v1350_v52 }
 0x2ae   :  { %3879 = vst [vmem:[#allocation46_spill] sm:$0xff] %v3878_v42  ;;  %v1988_v12 = vpop.eup %1987  ;;  %vm2901_vm11 = vcmp.lt.f32.partialorder %v1316_v18, 0.0004427343  ;;  %v1379_v43 = vand.u32 2147483647, %v2749_v13  ;;  %v1394_v24 = vmul.f32 -0.5, %v2759_v17  ;;  %2007 = vlog2.f32 %v1391_v32 }
 0x2af   :  { %3880 = vst [vmem:[#allocation47_spill] sm:$0xff] %v2899_v23  ;;  %3883 = vst [vmem:[#allocation48_spill] sm:$0xff] %v2906_v58  ;;  %v1990_v36 = vpop.eup %1989  ;;  %v2910_v19 = vmul.f32 0.6931472, %v1982_v39  ;;  %v1386_v22 = vadd.f32 1.0, %v1385_v21  ;;  %v1400_v60 = vadd.f32 1.0, %v2765_v6  ;;  %v2926_v27 = vmul.f32 %v2744_v61, %v1359_v20 }
 0x2b0   :  { %v1992_v15 = vpop.eup %1991  ;;  %v2913_v8 = vmul.f32 0.6931472, %v1984_v3  ;;  %v2915_v18 = vmul.f32 0.6931472, %v1986_v62  ;;  %vm2917_vm12 = vcmp.lt.f32.partialorder %v1325_v44, 0.0004427343  ;;  %v2936_v44 = vmul.f32 %v2749_v13, %v1377_v38 }
 0x2b1   :  { %3884 = vst [vmem:[#allocation49_spill] sm:$0xff] %v2910_v19  ;;  %vm2921_vm13 = vcmp.lt.f32.partialorder %v1334_v57, 0.0004427343  ;;  %v3888_v52 = vmov 0  ;;  %v1388_v39 = vand.u32 2147483647, %v2755_v29  ;;  %v1994_v21 = vpop.eup %1993  ;;  %2009 = vlog2.f32 %v1400_v60 }
 0x2b2   :  { %3885 = vst [vmem:[#allocation50_spill] sm:$0xff] %v2915_v18  ;;  %v3889_v52 = vsel %vm2921_vm13, 4294967295, %v3888_v52  ;;  %v2933_v32 = vmul.f32 0.6931472, %v1988_v12  ;;  %3891 = vst [vmem:[#allocation52_spill] sm:$0xff] %v2936_v44  ;;  %v1996_v57 = vpop.eup %1995  ;;  %v3892_v62 = vmov 0  ;;  %v3968_v55 = vsel %vm2866_vm7, %v2802_v35, %v2913_v8 }
 0x2b3   :  { %v2942_v20 = vmul.f32 0.6931472, %v1990_v36  ;;  %vm2944_vm14 = vcmp.lt.f32.partialorder %v1343_v34, 0.0004427343  ;;  %vm2948_vm15 = vcmp.lt.f32.partialorder %v1352_v14, 0.0004427343  ;;  %v1998_v13 = vpop.eup %1997  ;;  %v2964_v34 = vmul.f32 %v2755_v29, %v1386_v22 }
 0x2b4   :  { %3890 = vst [vmem:[#allocation51_spill] sm:$0xff] %v2933_v32  ;;  %v3893_v62 = vsel %vm2944_vm14, 4294967295, %v3892_v62  ;;  %v3894_v3 = vmov 0  ;;  %v1395_v12 = vadd.f32 1.0, %v1394_v24  ;;  %v1403_v38 = vmul.f32 -0.5, %v2765_v6  ;;  %v2000_v24 = vpop.eup %1999  ;;  %v3975_v8 = vld [vmem:[#allocation19_spill] sm:$0xff] }
 0x2b5   :  { %v3895_v3 = vsel %vm2948_vm15, 4294967295, %v3894_v3  ;;  %v2957_v61 = vmul.f32 0.6931472, %v1992_v15  ;;  %vm2959_vm0 = vcmp.lt.f32.partialorder %v1361_v56, 0.0004427343  ;;  %v3897_v36 = vmov 0  ;;  %v2002_v19 = vpop.eup %2001 }
 0x2b6   :  { %3896 = vst [vmem:[#allocation53_spill] sm:$0xff] %v3895_v3  ;;  %v3898_v36 = vsel %vm2959_vm0, 4294967295, %v3897_v36  ;;  %3899 = vst [vmem:[#allocation54_spill] sm:$0xff] %v2964_v34  ;;  %v1409_v14 = vadd.f32 1.0, %v2770_v31  ;;  %v1397_v56 = vand.u32 2147483647, %v2759_v17  ;;  %v2004_v18 = vpop.eup %2003 }
 0x2b7   :  { %v1412_v60 = vmul.f32 -0.5, %v2770_v31  ;;  %v2981_v22 = vmul.f32 0.6931472, %v1994_v21  ;;  %v2983_v28 = vmul.f32 0.6931472, %v1996_v57  ;;  %v3900_v23 = vmov 0  ;;  %v2006_v29 = vpop.eup %2005 }
 0x2b8   :  { %vm2985_vm1 = vcmp.lt.f32.partialorder %v1379_v43, 0.0004427343  ;;  %vm2989_vm2 = vcmp.lt.f32.partialorder %v1388_v39, 0.0004427343  ;;  %v3903_v15 = vmov 0  ;;  %2011 = vlog2.f32 %v1409_v14  ;;  %v3964_v1 = vld [vmem:[#allocation49_spill] sm:$0xff] }
 0x2b9   :  { %v3901_v23 = vsel %vm2985_vm1, 4294967295, %v3900_v23  ;;  %v3904_v15 = vsel %vm2989_vm2, 4294967295, %v3903_v15  ;;  %v2998_v21 = vmul.f32 %v2759_v17, %v1395_v12  ;;  %v1404_v57 = vadd.f32 1.0, %v1403_v38 }
 0x2ba   :  { %3902 = vst [vmem:[#allocation55_spill] sm:$0xff] %v3901_v23  ;;  %3905 = vst [vmem:[#allocation56_spill] sm:$0xff] %v3904_v15  ;;  %v1418_v43 = vadd.f32 1.0, %v2775_v11  ;;  %v3005_v32 = vmul.f32 0.6931472, %v1998_v13  ;;  %v1413_v63 = vadd.f32 1.0, %v1412_v60 }
 0x2bb   :  { %3906 = vst [vmem:[#allocation57_spill] sm:$0xff] %v2998_v21  ;;  %v3007_v14 = vmul.f32 0.6931472, %v2000_v24  ;;  %v1406_v40 = vand.u32 2147483647, %v2765_v6  ;;  %v1421_v17 = vmul.f32 -0.5, %v2775_v11  ;;  %v3032_v39 = vmul.f32 %v2765_v6, %v1404_v57 }
 0x2bc   :  { %3907 = vst [vmem:[#allocation58_spill] sm:$0xff] %v3005_v32  ;;  %v3010_v42 = vmul.f32 0.6931472, %v2002_v19  ;;  %2013 = vlog2.f32 %v1418_v43  ;;  %v1427_v13 = vadd.f32 1.0, %v2781_v7  ;;  %v1430_v24 = vmul.f32 -0.5, %v2781_v7 }
 0x2bd   :  { %3908 = vst [vmem:[#allocation59_spill] sm:$0xff] %v3007_v14  ;;  %v3023_v19 = vmul.f32 0.6931472, %v2004_v18  ;;  %v3025_v60 = vmul.f32 0.6931472, %v2006_v29  ;;  %v3912_v43 = vmov 0  ;;  %v2008_v29 = vpop.eup %2007  ;;  %v3053_v38 = vmul.f32 %v2770_v31, %v1413_v63 }
 0x2be   :  { %3909 = vst [vmem:[#allocation60_spill] sm:$0xff] %v3010_v42  ;;  %vm3027_vm3 = vcmp.lt.f32.partialorder %v1397_v56, 0.0004427343  ;;  %3914 = vst [vmem:[#allocation63_spill] sm:$0xff] %v3032_v39  ;;  %v1436_v12 = vadd.f32 1.0, %v2790_v33  ;;  %2015 = vlog2.f32 %v1427_v13  ;;  %v3915_v57 = vmov 0  ;;  %v2010_v3 = vpop.eup %2009 }
 0x2bf   :  { %3910 = vst [vmem:[#allocation61_spill] sm:$0xff] %v3023_v19  ;;  %3911 = vst [vmem:[#allocation62_spill] sm:$0xff] %v3025_v60  ;;  %v3913_v43 = vsel %vm3027_vm3, 4294967295, %v3912_v43  ;;  %v1415_v56 = vand.u32 2147483647, %v2770_v31  ;;  %v1422_v32 = vadd.f32 1.0, %v1421_v17 }
 0x2c0   :  { %vm3048_vm13 = vcmp.lt.f32.partialorder %v1406_v40, 0.0004427343  ;;  %2017 = vlog2.f32 %v1436_v12  ;;  %v1424_v18 = vand.u32 2147483647, %v2775_v11  ;;  %v1431_v14 = vadd.f32 1.0, %v1430_v24 }
 0x2c1   :  { %v3916_v57 = vsel %vm3048_vm13, 4294967295, %v3915_v57  ;;  %v1439_v13 = vmul.f32 -0.5, %v2790_v33  ;;  %v1445_v58 = vadd.f32 1.0, %v2795_v53  ;;  %v1448_v63 = vmul.f32 -0.5, %v2795_v53 }
 0x2c2   :  { %3917 = vst [vmem:[#allocation64_spill] sm:$0xff] %v3916_v57  ;;  %v1454_v17 = vadd.f32 1.0, %v2799_v45  ;;  %v3068_v12 = vmul.f32 0.6931472, %v2008_v29  ;;  %vm3070_vm0 = vcmp.lt.f32.partialorder %v1415_v56, 0.0004427343  ;;  %v3077_v19 = vmul.f32 %v2775_v11, %v1422_v32 }
 0x2c3   :  { %v3919_v24 = vmov 0  ;;  %v1433_v6 = vand.u32 2147483647, %v2781_v7  ;;  %2019 = vlog2.f32 %v1445_v58  ;;  %v1457_v40 = vmul.f32 -0.5, %v2799_v45 }
 0x2c4   :  { %3918 = vst [vmem:[#allocation65_spill] sm:$0xff] %v3068_v12  ;;  %v3920_v24 = vsel %vm3070_vm0, 4294967295, %v3919_v24  ;;  %3922 = vst [vmem:[#allocation67_spill] sm:$0xff] %v3077_v19  ;;  %v1442_v31 = vand.u32 2147483647, %v2790_v33  ;;  %2021 = vlog2.f32 %v1454_v17  ;;  %v1463_v60 = vadd.f32 1.0, %v2806_v26 }
 0x2c5   :  { %3921 = vst [vmem:[#allocation66_spill] sm:$0xff] %v3920_v24  ;;  %v3081_v34 = vmul.f32 0.6931472, %v2010_v3  ;;  %v3084_v56 = vmul.f32 %v2781_v7, %v1431_v14  ;;  %v1440_v29 = vadd.f32 1.0, %v1439_v13  ;;  %v1466_v15 = vmul.f32 -0.5, %v2806_v26  ;;  %v2012_v44 = vpop.eup %2011 }
 0x2c6   :  { %vm3087_vm2 = vcmp.lt.f32.partialorder %v1424_v18, 0.0004427343  ;;  %v3924_v58 = vmov 0  ;;  %v1449_v11 = vadd.f32 1.0, %v1448_v63  ;;  %v1451_v32 = vand.u32 2147483647, %v2795_v53 }
 0x2c7   :  { %3923 = vst [vmem:[#allocation68_spill] sm:$0xff] %v3081_v34  ;;  %v3925_v58 = vsel %vm3087_vm2, 4294967295, %v3924_v58  ;;  %2023 = vlog2.f32 %v1463_v60  ;;  %v1472_v17 = vadd.f32 1.0, %v2811_v10  ;;  %vm3097_vm1 = vcmp.lt.f32.partialorder %v1433_v6, 0.0004427343 }
 0x2c8   :  { %v3926_v3 = vmov 0  ;;  %v1458_v14 = vadd.f32 1.0, %v1457_v40  ;;  %v1460_v18 = vand.u32 2147483647, %v2799_v45  ;;  %v1475_v13 = vmul.f32 -0.5, %v2811_v10 }
 0x2c9   :  { %v3927_v3 = vsel %vm3097_vm1, 4294967295, %v3926_v3  ;;  %v3103_v63 = vmul.f32 0.6931472, %v2012_v44  ;;  %v1467_v23 = vadd.f32 1.0, %v1466_v15  ;;  %2025 = vlog2.f32 %v1472_v17  ;;  %v2014_v42 = vpop.eup %2013 }
 0x2ca   :  { %v1481_v60 = vadd.f32 1.0, %v2815_v49  ;;  %v3111_v7 = vmul.f32 %v2790_v33, %v1440_v29  ;;  %vm3113_vm3 = vcmp.lt.f32.partialorder %v1442_v31, 0.0004427343  ;;  %v3928_v40 = vmov 0 }
 0x2cb   :  { %v3929_v40 = vsel %vm3113_vm3, 4294967295, %v3928_v40  ;;  %v1469_v44 = vand.u32 2147483647, %v2806_v26  ;;  %v1484_v15 = vmul.f32 -0.5, %v2815_v49  ;;  %v3120_v17 = vmul.f32 %v2795_v53, %v1449_v11  ;;  %v2016_v11 = vpop.eup %2015 }
 0x2cc   :  { %vm3122_vm15 = vcmp.lt.f32.partialorder %v1451_v32, 0.0004427343  ;;  %v3930_v12 = vmov 0  ;;  %v1476_v57 = vadd.f32 1.0, %v1475_v13  ;;  %v1478_v6 = vand.u32 2147483647, %v2811_v10 }
 0x2cd   :  { %v3931_v12 = vsel %vm3122_vm15, 4294967295, %v3930_v12  ;;  %2027 = vlog2.f32 %v1481_v60  ;;  %v3127_v33 = vmul.f32 0.6931472, %v2014_v42  ;;  %vm3129_vm13 = vcmp.lt.f32.partialorder %v1460_v18, 0.0004427343  ;;  %v2018_v60 = vpop.eup %2017 }
 0x2ce   :  { %3932 = vst [vmem:[#allocation69_spill] sm:$0xff] %v3931_v12  ;;  %v1485_v29 = vadd.f32 1.0, %v1484_v15  ;;  %v1490_v34 = vadd.f32 1.0, %v2822_v48  ;;  %v1493_v53 = vmul.f32 -0.5, %v2822_v48  ;;  %v3140_v13 = vmul.f32 %v2799_v45, %v1458_v14 }
 0x2cf   :  { %3933 = vst [vmem:[#allocation70_spill] sm:$0xff] %v3127_v33  ;;  %v3143_v42 = vmul.f32 %v2806_v26, %v1467_v23  ;;  %v1499_v18 = vadd.f32 1.0, %v2826_v51  ;;  %v3146_v15 = vmul.f32 0.6931472, %v2016_v11  ;;  %vm3148_vm14 = vcmp.lt.f32.partialorder %v1469_v44, 0.0004427343 }
 0x2d0   :  { %3936 = vst [vmem:[#allocation71_spill] sm:$0xff] %v3140_v13  ;;  %v1487_v21 = vand.u32 2147483647, %v2815_v49  ;;  %2029 = vlog2.f32 %v1490_v34  ;;  %v1494_v24 = vadd.f32 1.0, %v1493_v53  ;;  %v3153_v32 = vmul.f32 0.6931472, %v2018_v60 }
 0x2d1   :  { %v3156_v45 = vmul.f32 %v2811_v10, %v1476_v57  ;;  %2031 = vlog2.f32 %v1499_v18  ;;  %v1502_v26 = vmul.f32 -0.5, %v2826_v51  ;;  %vm3163_vm0 = vcmp.lt.f32.partialorder %v1478_v6, 0.0004427343  ;;  %v2020_v57 = vpop.eup %2019  ;;  %v3944_v33 = vld [vmem:[#allocation44_spill] sm:$0xff] }
 0x2d2   :  { %v3168_v34 = vmul.f32 %v2815_v49, %v1485_v29  ;;  %v1496_v44 = vand.u32 2147483647, %v2822_v48  ;;  %v1517_v10 = vadd.f32 1.0, %v2830_v0  ;;  %v3177_v11 = vmul.f32 %v2822_v48, %v1494_v24  ;;  %v2022_v60 = vpop.eup %2021 }
 0x2d3   :  { %v1503_v6 = vadd.f32 1.0, %v1502_v26  ;;  %v1520_v18 = vmul.f32 -0.5, %v2830_v0  ;;  %v3180_v23 = vmul.f32 0.6931472, %v2020_v57  ;;  %vm3182_vm2 = vcmp.lt.f32.partialorder %v1487_v21, 0.0004427343 }
 0x2d4   :  { %3941 = vst [vmem:[#allocation72_spill] sm:$0xff] %v3177_v11  ;;  %v3942_v49 = vmov 0  ;;  %v1505_v29 = vand.u32 2147483647, %v2826_v51  ;;  %2033 = vlog2.f32 %v1517_v10  ;;  %v1526_v19 = vadd.f32 1.0, %v3944_v33  ;;  %v2024_v53 = vpop.eup %2023  ;;  %v3952_v21 = vld [vmem:[#allocation13_spill] sm:$0xff] }
 0x2d5   :  { %v3943_v49 = vsel %vm3182_vm2, 4294967295, %v3942_v49  ;;  %v3192_v24 = vmul.f32 0.6931472, %v2022_v60  ;;  %v1521_v26 = vadd.f32 1.0, %v1520_v18  ;;  %v1523_v57 = vand.u32 2147483647, %v2830_v0 }
 0x2d6   :  { %v3200_v10 = vmul.f32 %v2826_v51, %v1503_v6  ;;  %2035 = vlog2.f32 %v1526_v19  ;;  %v1529_v11 = vmul.f32 -0.5, %v3944_v33  ;;  %v3207_v18 = vmul.f32 0.6931472, %v2024_v53  ;;  %v2026_v6 = vpop.eup %2025  ;;  %v3951_v19 = vld [vmem:[#allocation12_spill] sm:$0xff] }
 0x2d7   :  { %3945 = vst [vmem:[#allocation44_spill] sm:$0xff] %v3192_v24  ;;  %vm3209_vm3 = vcmp.lt.f32.partialorder %v1496_v44, 0.0004427343  ;;  %v3947_v48 = vmov 0  ;;  %v3214_v12 = vmul.f32 %v2830_v0, %v1521_v26  ;;  %v1532_v51 = vand.u32 2147483647, %v3944_v33 }
 0x2d8   :  { %3946 = vst [vmem:[#allocation73_spill] sm:$0xff] %v3200_v10  ;;  %v3948_v48 = vsel %vm3209_vm3, 4294967295, %v3947_v48  ;;  %vm1055_vm15 = vcmp.ne.f32.partialorder %v3951_v19, %v3951_v19  ;;  %vm3221_vm2 = vcmp.lt.f32.partialorder %v1505_v29, 0.0004427343  ;;  %v3953_v60 = vmov 0  ;;  %v3959_v10 = vld [vmem:[#allocation47_spill] sm:$0xff] }
 0x2d9   :  { %3949 = vst [vmem:[#allocation74_spill] sm:$0xff] %v3948_v48  ;;  %3950 = vst [vmem:[#allocation75_spill] sm:$0xff] %v3214_v12  ;;  %v3954_v60 = vsel %vm3221_vm2, 4294967295, %v3953_v60  ;;  %v1530_v44 = vadd.f32 1.0, %v1529_v11  ;;  %v3956_v53 = vmax.f32 %v3951_v19, 0.0  ;;  %v3957_v0 = vsel %vm2840_vm4, %v2778_v9, %v2889_v47  ;;  %v3963_v19 = vld [vmem:[#allocation42_spill] sm:$0xff] }
 0x2da   :  { %3955 = vst [vmem:[#allocation13_spill] sm:$0xff] %v3954_v60  ;;  %v3958_v12 = vmax.f32 %v3952_v21, 0.0  ;;  %v3960_v29 = vsel %vm2848_vm5, %v2784_v59, %v3959_v10  ;;  %v3961_v60 = vld [vmem:[#allocation14_spill] sm:$0xff]  ;;  %v3965_v24 = vsel %vm2858_vm6, %v3963_v19, %v3964_v1  ;;  %v3966_v47 = vld [vmem:[#allocation15_spill] sm:$0xff]  ;;  %v1471_v59 = vsel %vm3148_vm14, %v3143_v42, %v3207_v18  ;;  %v2028_v39 = vpop.eup %2027  ;;  %v3973_v42 = vld [vmem:[#allocation17_spill] sm:$0xff] }
 0x2db   :  { %v3232_v26 = vadd.f32 %v3957_v0, %v3956_v53  ;;  %v3962_v11 = vmax.f32 %v3961_v60, 0.0  ;;  %vm1057_vm4 = vcmp.ne.f32.partialorder %v3961_v60, %v3961_v60  ;;  %vm1058_vm1 = vcmp.ne.f32.partialorder %v3966_v47, %v3966_v47  ;;  %v3971_v19 = vld [vmem:[#allocation50_spill] sm:$0xff]  ;;  %v3978_v18 = vld [vmem:[#allocation43_spill] sm:$0xff] }
 0x2dc   :  { %v3241_v48 = vadd.f32 %v3960_v29, %v3958_v12  ;;  %v1474_v9 = vmul.f32 0.6931472, %v2026_v6  ;;  %v3967_v25 = vmax.f32 %v3966_v47, 0.0  ;;  %v3972_v53 = vsel %vm2870_vm8, %v2818_v30, %v3971_v19  ;;  %v3979_v6 = vld [vmem:[#allocation51_spill] sm:$0xff] }
 0x2dd   :  { %v3250_v13 = vadd.f32 %v3965_v24, %v3962_v11  ;;  %v3969_v24 = vld [vmem:[#allocation16_spill] sm:$0xff]  ;;  %vm1060_vm6 = vcmp.ne.f32.partialorder %v3973_v42, %v3973_v42  ;;  %v3287_v35 = vmul.f32 %v3944_v33, %v1530_v44  ;;  %v3976_v30 = vmax.f32 %v3973_v42, 0.0 }
 0x2de   :  { %v3267_v12 = vadd.f32 %v3968_v55, %v3967_v25  ;;  %v3970_v10 = vmax.f32 %v3969_v24, 0.0  ;;  %vm1059_vm5 = vcmp.ne.f32.partialorder %v3969_v24, %v3969_v24  ;;  %v3980_v29 = vsel %vm2880_vm9, %v3978_v18, %v3979_v6  ;;  %v4005_v6 = vld [vmem:[#allocation48_spill] sm:$0xff] }
 0x2df   :  { %v3296_v11 = vadd.f32 %v3980_v29, %v3976_v30  ;;  %v3981_v1 = vmax.f32 %v3974_v37, 0.0  ;;  %v3983_v55 = vsel %vm2891_vm10, %v2853_v54, %v2942_v20  ;;  %v3984_v33 = vmax.f32 %v3975_v8, 0.0  ;;  %v3987_v30 = vld [vmem:[#allocation21_spill] sm:$0xff]  ;;  %v4006_v29 = vld [vmem:[#allocation59_spill] sm:$0xff] }
 0x2e0   :  { %v3276_v0 = vadd.f32 %v3972_v53, %v3970_v10  ;;  %v3985_v44 = vsel %vm2901_vm11, %v2863_v5, %v2957_v61  ;;  %v3986_v53 = vld [vmem:[#allocation20_spill] sm:$0xff]  ;;  %v1480_v54 = vsel %vm3163_vm0, %v3156_v45, %v1474_v9  ;;  %v1483_v20 = vmul.f32 0.6931472, %v2028_v39  ;;  %v3996_v9 = vld [vmem:[#allocation23_spill] sm:$0xff] }
 0x2e1   :  { %v3305_v10 = vadd.f32 %v3983_v55, %v3981_v1  ;;  %v3314_v19 = vadd.f32 %v3985_v44, %v3984_v33  ;;  %vm3323_vm10 = vcmp.lt.f32.partialorder %v1523_v57, 0.0004427343  ;;  %v3990_v16 = vmax.f32 %v3986_v53, 0.0  ;;  %v3995_v57 = vld [vmem:[#allocation22_spill] sm:$0xff] }
 0x2e2   :  { %v3991_v5 = vsel %vm2917_vm12, %v2875_v4, %v2981_v22  ;;  %v3992_v18 = vmax.f32 %v3987_v30, 0.0  ;;  %vm3993_vm11 = vnez %v3889_v52  ;;  %v3998_v4 = vmax.f32 %v3995_v57, 0.0  ;;  %v4000_v52 = vld [vmem:[#allocation58_spill] sm:$0xff] }
 0x2e3   :  { %v3334_v61 = vadd.f32 %v3991_v5, %v3990_v16  ;;  %v3994_v45 = vsel %vm3993_vm11, %v2885_v2, %v2983_v28  ;;  %vm3999_vm8 = vnez %v3893_v62  ;;  %v4002_v28 = vmax.f32 %v3996_v9, 0.0  ;;  %v4003_v2 = vld [vmem:[#allocation53_spill] sm:$0xff]  ;;  %v4010_v62 = vld [vmem:[#allocation60_spill] sm:$0xff]  ;;  %v4014_v5 = vld [vmem:[#allocation55_spill] sm:$0xff] }
 0x2e4   :  { %v3343_v14 = vadd.f32 %v3994_v45, %v3992_v18  ;;  %v4001_v22 = vsel %vm3999_vm8, %v2896_v46, %v4000_v52  ;;  %vm4004_vm11 = vnez %v4003_v2  ;;  %v4008_v55 = vmax.f32 %v3997_v41, 0.0  ;;  %v4012_v46 = vld [vmem:[#allocation25_spill] sm:$0xff]  ;;  %v4016_v18 = vld [vmem:[#allocation52_spill] sm:$0xff] }
 0x2e5   :  { %v3358_v39 = vadd.f32 %v4001_v22, %v3998_v4  ;;  %v4007_v1 = vsel %vm4004_vm11, %v4005_v6, %v4006_v29  ;;  %vm4009_vm12 = vnez %v3898_v36  ;;  %v4013_v16 = vmax.f32 %v4012_v46, 0.0  ;;  %v4017_v45 = vld [vmem:[#allocation61_spill] sm:$0xff]  ;;  %v2030_v22 = vpop.eup %2029  ;;  %v4020_v36 = vld [vmem:[#allocation27_spill] sm:$0xff]  ;;  %v4025_v29 = vld [vmem:[#allocation56_spill] sm:$0xff] }
 0x2e6   :  { %v3367_v25 = vadd.f32 %v4007_v1, %v4002_v28  ;;  %v4011_v33 = vsel %vm4009_vm12, %v2926_v27, %v4010_v62  ;;  %vm4015_vm8 = vnez %v4014_v5  ;;  %v4019_v28 = vld [vmem:[#allocation26_spill] sm:$0xff]  ;;  %vm4021_vm0 = vnez %v3943_v49  ;;  %v4032_v5 = vld [vmem:[#allocation57_spill] sm:$0xff] }
 0x2e7   :  { %v3376_v44 = vadd.f32 %v4011_v33, %v4008_v55  ;;  %v4018_v4 = vsel %vm4015_vm8, %v4016_v18, %v4017_v45  ;;  %v1489_v27 = vsel %vm4021_vm0, %v3168_v34, %v1483_v20  ;;  %vm3396_vm14 = vcmp.lt.f32.partialorder %v1532_v51, 0.0004427343  ;;  %v4027_v1 = vld [vmem:[#allocation54_spill] sm:$0xff]  ;;  %v4033_v49 = vld [vmem:[#allocation65_spill] sm:$0xff]  ;;  %v4035_v20 = vld [vmem:[#allocation28_spill] sm:$0xff] }
 0x2e8   :  { %v3385_v52 = vadd.f32 %v4018_v4, %v4013_v16  ;;  %v4024_v6 = vmax.f32 %v4019_v28, 0.0  ;;  %vm4026_vm8 = vnez %v4025_v29  ;;  %v4028_v55 = vld [vmem:[#allocation62_spill] sm:$0xff]  ;;  %v4030_v16 = vmax.f32 %v4020_v36, 0.0  ;;  %v4037_v45 = vld [vmem:[#allocation64_spill] sm:$0xff]  ;;  %v4039_v4 = vld [vmem:[#allocation63_spill] sm:$0xff] }
 0x2e9   :  { %v4029_v62 = vsel %vm4026_vm8, %v4027_v1, %v4028_v55  ;;  %vm4031_vm12 = vnez %v3913_v43  ;;  %v4036_v18 = vmax.f32 %v4035_v20, 0.0  ;;  %vm4038_vm0 = vnez %v4037_v45  ;;  %v4040_v29 = vld [vmem:[#allocation68_spill] sm:$0xff]  ;;  %v4042_v1 = vld [vmem:[#allocation29_spill] sm:$0xff]  ;;  %v4043_v43 = vld [vmem:[#allocation30_spill] sm:$0xff] }
 0x2ea   :  { %v3407_v33 = vadd.f32 %v4029_v62, %v4024_v6  ;;  %v4034_v34 = vsel %vm4031_vm12, %v4032_v5, %v4033_v49  ;;  %v4041_v28 = vsel %vm4038_vm0, %v4039_v4, %v4040_v29  ;;  %v2032_v6 = vpop.eup %2031  ;;  %v1492_v55 = vmul.f32 0.6931472, %v2030_v22  ;;  %v4053_v29 = vld [vmem:[#allocation31_spill] sm:$0xff] }
 0x2eb   :  { %v3416_v51 = vadd.f32 %v4034_v34, %v4030_v16  ;;  %v3425_v46 = vadd.f32 %v4041_v28, %v4036_v18  ;;  %v4044_v62 = vmax.f32 %v4042_v1, 0.0  ;;  %v4045_v16 = vld [vmem:[#allocation66_spill] sm:$0xff]  ;;  %v4048_v49 = vmax.f32 %v4043_v43, 0.0  ;;  %v4050_v34 = vld [vmem:[#allocation67_spill] sm:$0xff] }
 0x2ec   :  { %vm4046_vm11 = vnez %v4045_v16  ;;  %vm4049_vm0 = vnez %v3925_v58  ;;  %v4051_v18 = vld [vmem:[#allocation70_spill] sm:$0xff]  ;;  %v4054_v22 = vmax.f32 %v4053_v29, 0.0  ;;  %vm4055_vm12 = vnez %v3927_v3  ;;  %v4058_v58 = vld [vmem:[#allocation33_spill] sm:$0xff] }
 0x2ed   :  { %v4047_v5 = vsel %vm4046_vm11, %v3053_v38, %v3103_v63  ;;  %v4052_v45 = vsel %vm4049_vm0, %v4050_v34, %v4051_v18  ;;  %v4056_v16 = vsel %vm4055_vm12, %v3084_v56, %v3146_v15  ;;  %vm1075_vm11 = vcmp.ne.f32.partialorder %v4053_v29, %v4053_v29  ;;  %v4057_v38 = vld [vmem:[#allocation32_spill] sm:$0xff]  ;;  %v4059_v63 = vld [vmem:[#allocation34_spill] sm:$0xff] }
 0x2ee   :  { %v3440_v28 = vadd.f32 %v4047_v5, %v4044_v62  ;;  %v3449_v4 = vadd.f32 %v4052_v45, %v4048_v49  ;;  %v3458_v1 = vadd.f32 %v4056_v16, %v4054_v22  ;;  %vm1076_vm9 = vcmp.ne.f32.partialorder %v4057_v38, %v4057_v38  ;;  %v4064_v49 = vld [vmem:[#allocation69_spill] sm:$0xff]  ;;  %v4068_v45 = vld [vmem:[#allocation71_spill] sm:$0xff] }
 0x2ef   :  { %v1501_v62 = vmul.f32 0.6931472, %v2032_v6  ;;  %v4060_v3 = vmax.f32 %v4057_v38, 0.0  ;;  %vm4061_vm7 = vnez %v3929_v40  ;;  %v4063_v5 = vmax.f32 %v4058_v58, 0.0  ;;  %v4069_v40 = vld [vmem:[#allocation44_spill] sm:$0xff]  ;;  %v4083_v58 = vld [vmem:[#allocation41_spill] sm:$0xff] }
 0x2f0   :  { %v4062_v56 = vsel %vm4061_vm7, %v3111_v7, %v3153_v32  ;;  %vm4065_vm12 = vnez %v4064_v49  ;;  %v4067_v6 = vmax.f32 %v4059_v63, 0.0  ;;  %v4070_v22 = vsel %vm3129_vm13, %v4068_v45, %v4069_v40  ;;  %v4072_v7 = vld [vmem:[#allocation35_spill] sm:$0xff]  ;;  %v4073_v32 = vld [vmem:[#allocation36_spill] sm:$0xff] }
 0x2f1   :  { %v3475_v15 = vadd.f32 %v4062_v56, %v4060_v3  ;;  %v4066_v34 = vsel %vm4065_vm12, %v3120_v17, %v3180_v23  ;;  %vm1079_vm7 = vcmp.ne.f32.partialorder %v4072_v7, %v4072_v7  ;;  %vm1080_vm8 = vcmp.ne.f32.partialorder %v4073_v32, %v4073_v32  ;;  %v4074_v3 = vld [vmem:[#allocation37_spill] sm:$0xff]  ;;  %v4075_v17 = vld [vmem:[#allocation38_spill] sm:$0xff]  ;;  %v4076_v23 = vld [vmem:[#allocation72_spill] sm:$0xff] }
 0x2f2   :  { %v3484_v18 = vadd.f32 %v4066_v34, %v4063_v5  ;;  %v3493_v16 = vadd.f32 %v4070_v22, %v4067_v6  ;;  %v1498_v31 = vsel %vm3209_vm3, %v4076_v23, %v1492_v55  ;;  %v4078_v5 = vmax.f32 %v4072_v7, 0.0  ;;  %v2034_v22 = vpop.eup %2033  ;;  %v4081_v63 = vld [vmem:[#allocation39_spill] sm:$0xff]  ;;  %v4084_v55 = vld [vmem:[#allocation73_spill] sm:$0xff] }
 0x2f3   :  { %v4079_v34 = vmax.f32 %v4073_v32, 0.0  ;;  %v4080_v45 = vmax.f32 %v4074_v3, 0.0  ;;  %vm1083_vm13 = vcmp.ne.f32.partialorder %v4081_v63, %v4081_v63  ;;  %vm1086_vm12 = vcmp.ne.f32.partialorder %v4083_v58, %v4083_v58 }
 0x2f4   :  { %4071 = vst [vmem:[#allocation47_spill] sm:$0xff] %v3493_v16  ;;  %v1559_v49 = vadd.f32 %v1471_v59, %v4078_v5  ;;  %v4082_v16 = vld [vmem:[#allocation40_spill] sm:$0xff]  ;;  %v1507_v59 = vsel %vm3221_vm2, %v4084_v55, %v1501_v62  ;;  %v4086_v56 = vmax.f32 %v4075_v17, 0.0  ;;  %vm4088_vm3 = vcmp.ne.f32.partialorder %v3952_v21, %v3952_v21 }
 0x2f5   :  { %v1560_v6 = vadd.f32 %v1480_v54, %v4079_v34  ;;  %v1561_v40 = vadd.f32 %v1489_v27, %v4080_v45  ;;  %vm1085_vm0 = vcmp.ne.f32.partialorder %v4082_v16, %v4082_v16  ;;  %v4087_v5 = vld [vmem:[#allocation12_spill] sm:$0xff]  ;;  %v1568_v34 = vsel %vm4088_vm3, %v3952_v21, %v3241_v48 }
 0x2f6   :  { %v1562_v54 = vadd.f32 %v1498_v31, %v4086_v56  ;;  %v1567_v27 = vsel %vm1055_vm15, %v4087_v5, %v3232_v26  ;;  %v1519_v45 = vmul.f32 0.6931472, %v2034_v22  ;;  %v4089_v3 = vmax.f32 %v4081_v63, 0.0  ;;  %1600 = vst [vmem:[#allocation8 + $0x8] sm:$0xff] %v1568_v34  ;;  %v2036_v31 = vpop.eup %2035 }
 0x2f7   :  { %v1569_v62 = vsel %vm1057_vm4, %v3961_v60, %v3250_v13  ;;  %v1570_v26 = vsel %vm1058_vm1, %v3966_v47, %v3267_v12  ;;  %1599 = vst [vmem:[#allocation8] sm:$0xff] %v1567_v27  ;;  %v1571_v48 = vsel %vm1059_vm5, %v3969_v24, %v3276_v0  ;;  %v1572_v13 = vsel %vm1060_vm6, %v3973_v42, %v3296_v11  ;;  %v4092_v47 = vld [vmem:[#allocation75_spill] sm:$0xff] }
 0x2f8   :  { %v1563_v23 = vadd.f32 %v1507_v59, %v4089_v3  ;;  %vm4090_vm15 = vcmp.ne.f32.partialorder %v3974_v37, %v3974_v37  ;;  %vm4091_vm1 = vcmp.ne.f32.partialorder %v3975_v8, %v3975_v8  ;;  %1601 = vst [vmem:[#allocation8 + $0x10] sm:$0xff] %v1569_v62  ;;  %1602 = vst [vmem:[#allocation8 + $0x18] sm:$0xff] %v1570_v26  ;;  %v1528_v24 = vmul.f32 0.6931472, %v2036_v31 }
 0x2f9   :  { %v1573_v21 = vsel %vm4090_vm15, %v3974_v37, %v3305_v10  ;;  %v1574_v60 = vsel %vm4091_vm1, %v3975_v8, %v3314_v19  ;;  %v1525_v12 = vsel %vm3323_vm10, %v4092_v47, %v1519_v45  ;;  %vm4093_vm2 = vcmp.ne.f32.partialorder %v3986_v53, %v3986_v53  ;;  %1603 = vst [vmem:[#allocation8 + $0x20] sm:$0xff] %v1571_v48 }
 0x2fa   :  { %v1575_v0 = vsel %vm4093_vm2, %v3986_v53, %v3334_v61  ;;  %vm4094_vm4 = vcmp.ne.f32.partialorder %v3987_v30, %v3987_v30  ;;  %1604 = vst [vmem:[#allocation8 + $0x28] sm:$0xff] %v1572_v13  ;;  %1605 = vst [vmem:[#allocation8 + $0x30] sm:$0xff] %v1573_v21  ;;  %v4095_v37 = vmax.f32 %v4082_v16, 0.0  ;;  %vm4096_vm5 = vcmp.ne.f32.partialorder %v3995_v57, %v3995_v57  ;;  %v4101_v61 = vld [vmem:[#allocation26_spill] sm:$0xff] }
 0x2fb   :  { %v1576_v42 = vsel %vm4094_vm4, %v3987_v30, %v3343_v14  ;;  %1606 = vst [vmem:[#allocation8 + $0x38] sm:$0xff] %v1574_v60  ;;  %v1577_v11 = vsel %vm4096_vm5, %v3995_v57, %v3358_v39  ;;  %vm4097_vm6 = vcmp.ne.f32.partialorder %v3996_v9, %v3996_v9  ;;  %vm4098_vm10 = vcmp.ne.f32.partialorder %v3997_v41, %v3997_v41  ;;  %v4099_v30 = vld [vmem:[#allocation25_spill] sm:$0xff] }
 0x2fc   :  { %v1565_v8 = vadd.f32 %v1525_v12, %v4095_v37  ;;  %v1578_v10 = vsel %vm4097_vm6, %v3996_v9, %v3367_v25  ;;  %v1579_v19 = vsel %vm4098_vm10, %v3997_v41, %v3376_v44  ;;  %1607 = vst [vmem:[#allocation8 + $0x40] sm:$0xff] %v1575_v0  ;;  %1608 = vst [vmem:[#allocation8 + $0x48] sm:$0xff] %v1576_v42  ;;  %v4106_v39 = vld [vmem:[#allocation29_spill] sm:$0xff] }
 0x2fd   :  { %v1534_v53 = vsel %vm3396_vm14, %v3287_v35, %v1528_v24  ;;  %vm4100_vm3 = vcmp.ne.f32.partialorder %v4099_v30, %v4099_v30  ;;  %vm4102_vm15 = vcmp.ne.f32.partialorder %v4101_v61, %v4101_v61  ;;  %vm4103_vm1 = vcmp.ne.f32.partialorder %v4020_v36, %v4020_v36  ;;  %1609 = vst [vmem:[#allocation8 + $0x50] sm:$0xff] %v1577_v11 }
 0x2fe   :  { %v1581_v50 = vsel %vm4100_vm3, %v4099_v30, %v3385_v52  ;;  %v1582_v14 = vsel %vm4102_vm15, %v4101_v61, %v3407_v33  ;;  %v1583_v57 = vsel %vm4103_vm1, %v4020_v36, %v3416_v51  ;;  %1610 = vst [vmem:[#allocation8 + $0x58] sm:$0xff] %v1578_v10  ;;  %1611 = vst [vmem:[#allocation8 + $0x60] sm:$0xff] %v1579_v19  ;;  %v4104_v35 = vmax.f32 %v4083_v58, 0.0  ;;  %v4109_v36 = vld [vmem:[#allocation33_spill] sm:$0xff]  ;;  %v4111_v33 = vld [vmem:[#allocation47_spill] sm:$0xff] }
 0x2ff   :  { %vm4105_vm14 = vcmp.ne.f32.partialorder %v4035_v20, %v4035_v20  ;;  %vm4107_vm2 = vcmp.ne.f32.partialorder %v4106_v39, %v4106_v39  ;;  %vm4108_vm4 = vcmp.ne.f32.partialorder %v4043_v43, %v4043_v43  ;;  %1613 = vst [vmem:[#allocation8 + $0x70] sm:$0xff] %v1581_v50  ;;  %1614 = vst [vmem:[#allocation8 + $0x78] sm:$0xff] %v1582_v14  ;;  %v4112_v51 = vld [vmem:[#allocation34_spill] sm:$0xff] }
 0x300   :  { %v1566_v9 = vadd.f32 %v1534_v53, %v4104_v35  ;;  %v1584_v41 = vsel %vm4105_vm14, %v4035_v20, %v3425_v46  ;;  %v1585_v25 = vsel %vm4107_vm2, %v4106_v39, %v3440_v28  ;;  %v1586_v44 = vsel %vm4108_vm4, %v4043_v43, %v3449_v4  ;;  %1615 = vst [vmem:[#allocation8 + $0x80] sm:$0xff] %v1583_v57  ;;  %v4114_v28 = vld [vmem:[#allocation37_spill] sm:$0xff] }
 0x301   :  { %v1587_v46 = vsel %vm1075_vm11, %v4053_v29, %v3458_v1  ;;  %v1588_v52 = vsel %vm1076_vm9, %v4057_v38, %v3475_v15  ;;  %vm4110_vm5 = vcmp.ne.f32.partialorder %v4109_v36, %v4109_v36  ;;  %vm4113_vm6 = vcmp.ne.f32.partialorder %v4112_v51, %v4112_v51  ;;  %1616 = vst [vmem:[#allocation8 + $0x88] sm:$0xff] %v1584_v41 }
 0x302   :  { %v1589_v2 = vsel %vm4110_vm5, %v4109_v36, %v3484_v18  ;;  %v1590_v20 = vsel %vm4113_vm6, %v4112_v51, %v4111_v33  ;;  %1617 = vst [vmem:[#allocation8 + $0x90] sm:$0xff] %v1585_v25  ;;  %1618 = vst [vmem:[#allocation8 + $0x98] sm:$0xff] %v1586_v44  ;;  %v1591_v1 = vsel %vm1079_vm7, %v4072_v7, %v1559_v49 }
 0x303   :  { %v1592_v43 = vsel %vm1080_vm8, %v4073_v32, %v1560_v6  ;;  %vm4115_vm9 = vcmp.ne.f32.partialorder %v4114_v28, %v4114_v28  ;;  %vm4116_vm11 = vcmp.ne.f32.partialorder %v4075_v17, %v4075_v17  ;;  %1619 = vst [vmem:[#allocation8 + $0xa0] sm:$0xff] %v1587_v46  ;;  %1620 = vst [vmem:[#allocation8 + $0xa8] sm:$0xff] %v1588_v52 }
 0x304   :  { %v1593_v4 = vsel %vm4115_vm9, %v4114_v28, %v1561_v40  ;;  %v1594_v29 = vsel %vm4116_vm11, %v4075_v17, %v1562_v54  ;;  %1621 = vst [vmem:[#allocation8 + $0xb0] sm:$0xff] %v1589_v2  ;;  %1622 = vst [vmem:[#allocation8 + $0xb8] sm:$0xff] %v1590_v20  ;;  %v1595_v38 = vsel %vm1083_vm13, %v4081_v63, %v1563_v23 }
 0x305   :  { %v1597_v15 = vsel %vm1085_vm0, %v4082_v16, %v1565_v8  ;;  %v1598_v18 = vsel %vm1086_vm12, %v4083_v58, %v1566_v9  ;;  %1623 = vst [vmem:[#allocation8 + $0xc0] sm:$0xff] %v1591_v1  ;;  %1624 = vst [vmem:[#allocation8 + $0xc8] sm:$0xff] %v1592_v43 }
 0x306   :  { %1625 = vst [vmem:[#allocation8 + $0xd0] sm:$0xff] %v1593_v4  ;;  %1626 = vst [vmem:[#allocation8 + $0xd8] sm:$0xff] %v1594_v29 }
 0x307   :  { %1627 = vst [vmem:[#allocation8 + $0xe0] sm:$0xff] %v1595_v38  ;;  %1629 = vst [vmem:[#allocation8 + $0xf0] sm:$0xff] %v1597_v15 }
 0x308   :  { %1630 = vst [vmem:[#allocation8 + $0xf8] sm:$0xff] %v1598_v18 }
 0x309   :  { %2108 = shalt.err (!%p2105_p5)
}
 0x30a   :  { %s2129_s29 = smov 128   ;;  %s2130_s30 = smov 8  }
 0x30b   :  { %1642 = dma.vmem_to_hbm [thread:$0]  %s1637_s2, 4096, %s3684_s3, [#allocation4], %s2129_s29, %s2129_s29, %s2130_s30  }
 0x30c   :  { %2121 = dma.done.wait [#allocation4], 4096  }
 0x30d   :  { %2122 = vsyncadd [#allocation4], 4294963200 }
 0x30e   :  { %1646 = vsyncpa [#allocation3], 1 }
 0x30f   :  { %1647 = vsyncpa [#allocation6], 1 }
 0x310   :  { %1648 = vsyncpa [#allocation4], 1 }

</bundles_post_ra>
